<compile_context>
chip_gen: v7x
topology: tpu7x:2x2x1
jax: 0.10.0
libtpu: 0.0.40
codegen_flags: <defaults>
</compile_context>

<pallas_src>
import jax
import jax.numpy as jnp
from jax.experimental import pallas as pl
from jax.experimental.pallas import tpu as pltpu

IMAGE_SIZE = 784
H_DIM = 400
Z_DIM = 20


def vae_kernel(x_ref, eps_ref,
               we_ref, be_ref,
               wmulv_ref, bmulv_ref,
               wd1_ref, bd1_ref,
               wd2_ref, bd2_ref,
               xr_ref, mulv_ref):
    x = x_ref[...]                                                  # (TB, 784) bf16

    # ---- encode: h = relu(x @ We + be) ----
    h = jnp.dot(x, we_ref[...],
                preferred_element_type=jnp.float32) + be_ref[...]
    h = jnp.maximum(h, 0.0)                                         # (TB, 400) f32

    # ---- fused mu / log_var head: one (400, 40) matmul ----
    mulv = jnp.dot(h.astype(jnp.bfloat16), wmulv_ref[...],
                   preferred_element_type=jnp.float32) + bmulv_ref[...]   # (TB, 40)
    mu = mulv[:, :Z_DIM]
    lv = mulv[:, Z_DIM:]

    # ---- reparametrize: z = mu + eps * exp(log_var / 2)  (f32) ----
    z = mu + eps_ref[...] * jnp.exp(lv * 0.5)                       # (TB, 20)

    # ---- decode ----
    hd = jnp.dot(z.astype(jnp.bfloat16), wd1_ref[...],
                 preferred_element_type=jnp.float32) + bd1_ref[...]
    hd = jnp.maximum(hd, 0.0)                                       # (TB, 400)

    logits = jnp.dot(hd.astype(jnp.bfloat16), wd2_ref[...],
                     preferred_element_type=jnp.float32) + bd2_ref[...]   # (TB, 784)

    # sigmoid(x) = 1 / (1 + exp(-x)): exp + approx reciprocal on the EUP slot,
    # clamped so the approximation can never leave [0, 1].
    y = pl.reciprocal(1.0 + jnp.exp(-logits), approx=True)
    xr_ref[...] = jnp.minimum(jnp.maximum(y, 0.0), 1.0)
    mulv_ref[...] = mulv                                            # packed mu | log_var


def _prepare_params(params):
    """Fuse mu/log_var heads, cast weights to bf16 (biases stay f32)."""
    (we, be, wmu, bmu, wlv, blv, wd1, bd1, wd2, bd2) = params
    bf = jnp.bfloat16
    wmulv = jnp.concatenate([wmu, wlv], axis=1)     # (400, 40)
    bmulv = jnp.concatenate([bmu, blv], axis=1)     # (1, 40)
    return (we.astype(bf), be,
            wmulv.astype(bf), bmulv,
            wd1.astype(bf), bd1,
            wd2.astype(bf), bd2)


def _pick_tile_b(B):
    """Largest MXU-friendly divisor of B that still gives >= 2 grid steps."""
    for cand in (1024, 512, 256, 128, 64, 32, 16, 8):
        if B % cand == 0 and B // cand >= 2:
            return cand
    return B        # tiny batch: single full-batch tile


def vae_forward(x, eps, params, *, tile_b=None):
    B = x.shape[0]
    if tile_b is None:
        tile_b = _pick_tile_b(B)
    assert B % tile_b == 0, "tile_b must divide the batch"
    assert tile_b == B or tile_b % 8 == 0, "tile_b must be a multiple of 8 (sublane)"

    (we, be, wmulv, bmulv, wd1, bd1, wd2, bd2) = _prepare_params(params)

    x_bf = x.astype(jnp.bfloat16)           # halve the dominant HBM input stream
    eps = eps.astype(jnp.float32)

    def full_spec(a):
        nd = a.ndim
        return pl.BlockSpec(a.shape, lambda i: (0,) * nd)   # grid-invariant full block

    grid = (B // tile_b,)

    in_specs = [
        pl.BlockSpec((tile_b, IMAGE_SIZE), lambda i: (i, 0)),   # x (bf16, unpadded)
        pl.BlockSpec((tile_b, Z_DIM), lambda i: (i, 0)),        # eps
        full_spec(we), full_spec(be),
        full_spec(wmulv), full_spec(bmulv),
        full_spec(wd1), full_spec(bd1),
        full_spec(wd2), full_spec(bd2),
    ]
    out_specs = [
        pl.BlockSpec((tile_b, IMAGE_SIZE), lambda i: (i, 0)),   # x_reconstructed
        pl.BlockSpec((tile_b, 2 * Z_DIM), lambda i: (i, 0)),    # packed mu | log_var
    ]
    out_shape = [
        jax.ShapeDtypeStruct((B, IMAGE_SIZE), jnp.float32),
        jax.ShapeDtypeStruct((B, 2 * Z_DIM), jnp.float32),
    ]

    xr, mulv = pl.pallas_call(
        vae_kernel,
        out_shape=out_shape,
        grid_spec=pltpu.PrefetchScalarGridSpec(
            num_scalar_prefetch=0,
            grid=grid,
            in_specs=in_specs,
            out_specs=out_specs,
        ),
        compiler_params=pltpu.CompilerParams(
            dimension_semantics=("parallel",),
            vmem_limit_bytes=48 * 1024 * 1024,   # covers tile_b up to 1024, < v7x 64 MiB
        ),
    )(x_bf, eps, we, be, wmulv, bmulv, wd1, bd1, wd2, bd2)

    mu = mulv[:, :Z_DIM]
    log_var = mulv[:, Z_DIM:]
    return xr, mu, log_var


def init_params(key):
    """PyTorch nn.Linear-style uniform init, pre-transposed to (in, out)."""
    def linear(key, fan_in, fan_out):
        k_w, k_b = jax.random.split(key)
        bound = 1.0 / (fan_in ** 0.5)
        w = jax.random.uniform(k_w, (fan_in, fan_out), jnp.float32, -bound, bound)
        b = jax.random.uniform(k_b, (1, fan_out), jnp.float32, -bound, bound)
        return w, b

    keys = jax.random.split(key, 5)
    we, be = linear(keys[0], IMAGE_SIZE, H_DIM)      # fc_enc
    wmu, bmu = linear(keys[1], H_DIM, Z_DIM)         # fc_mu
    wlv, blv = linear(keys[2], H_DIM, Z_DIM)         # fc_log_var
    wd1, bd1 = linear(keys[3], Z_DIM, H_DIM)         # fc_dec1
    wd2, bd2 = linear(keys[4], H_DIM, IMAGE_SIZE)    # fc_dec2
    return (we, be, wmu, bmu, wlv, blv, wd1, bd1, wd2, bd2)


def reference_forward(x, eps, params):
    """Pure-JAX f32 reference matching the PyTorch module."""
    (we, be, wmu, bmu, wlv, blv, wd1, bd1, wd2, bd2) = params
    h = jnp.maximum(x @ we + be, 0.0)
    mu = h @ wmu + bmu
    lv = h @ wlv + blv
    z = mu + eps * jnp.exp(lv / 2)
    hd = jnp.maximum(z @ wd1 + bd1, 0.0)
    xr = jax.nn.sigmoid(hd @ wd2 + bd2)
    return xr, mu, lv


if __name__ == "__main__":
    key = jax.random.PRNGKey(0)
    k_param, k_x, k_eps = jax.random.split(key, 3)

    B = 16                       # small demo batch; tile_b=8 -> grid=(2,) exercises tiling
    params = init_params(k_param)
    x = jax.random.uniform(k_x, (B, IMAGE_SIZE), jnp.float32)      # flattened "image" batch
    eps = jax.random.uniform(k_eps, (B, Z_DIM), jnp.float32)       # torch.rand_like -> U[0,1)

    x_rec, mu, log_var = vae_forward(x, eps, params, tile_b=8)
    jax.block_until_ready((x_rec, mu, log_var))

    # sanity check against a pure-JAX f32 reference (kernel matmuls are bf16 -> loose tol)
    xr_ref, mu_ref, lv_ref = reference_forward(x, eps, params)
    assert x_rec.shape == (B, IMAGE_SIZE) and mu.shape == (B, Z_DIM) and log_var.shape == (B, Z_DIM)
    assert jnp.allclose(x_rec, xr_ref, atol=2e-2), "x_reconstructed mismatch"
    assert jnp.allclose(mu, mu_ref, atol=2e-2), "mu mismatch"
    assert jnp.allclose(log_var, lv_ref, atol=2e-2), "log_var mismatch"

    print("KERNEL_OK")
</pallas_src>

<mosaic_0001>
module attributes {stable_mosaic.version = 11 : i64} {
  func.func @vae_kernel(%arg0: i32, %arg1: memref<8x784xbf16, #tpu.memory_space<vmem>>, %arg2: memref<8x20xf32, #tpu.memory_space<vmem>>, %arg3: memref<784x400xbf16, #tpu.memory_space<vmem>>, %arg4: memref<1x400xf32, #tpu.memory_space<vmem>>, %arg5: memref<400x40xbf16, #tpu.memory_space<vmem>>, %arg6: memref<1x40xf32, #tpu.memory_space<vmem>>, %arg7: memref<20x400xbf16, #tpu.memory_space<vmem>>, %arg8: memref<1x400xf32, #tpu.memory_space<vmem>>, %arg9: memref<400x784xbf16, #tpu.memory_space<vmem>>, %arg10: memref<1x784xf32, #tpu.memory_space<vmem>>, %arg11: memref<8x784xf32, #tpu.memory_space<vmem>>, %arg12: memref<8x40xf32, #tpu.memory_space<vmem>>) attributes {dimension_semantics = [#tpu.dimension_semantics<parallel>], iteration_bounds = array<i64: 2>, scalar_prefetch = 0 : i64, scratch_operands = 0 : i64, tpu.core_type = #tpu.core_type<tc>, window_params = [{transform_indices = @transform_0, window_bounds = array<i64: 8, 784>}, {transform_indices = @transform_1, window_bounds = array<i64: 8, 20>}, {pipeline_mode = #tpu.pipeline_mode<synchronous>, transform_indices = @transform_2, window_bounds = array<i64: 784, 400>}, {pipeline_mode = #tpu.pipeline_mode<synchronous>, transform_indices = @transform_3, window_bounds = array<i64: 1, 400>}, {pipeline_mode = #tpu.pipeline_mode<synchronous>, transform_indices = @transform_4, window_bounds = array<i64: 400, 40>}, {pipeline_mode = #tpu.pipeline_mode<synchronous>, transform_indices = @transform_5, window_bounds = array<i64: 1, 40>}, {pipeline_mode = #tpu.pipeline_mode<synchronous>, transform_indices = @transform_6, window_bounds = array<i64: 20, 400>}, {pipeline_mode = #tpu.pipeline_mode<synchronous>, transform_indices = @transform_7, window_bounds = array<i64: 1, 400>}, {pipeline_mode = #tpu.pipeline_mode<synchronous>, transform_indices = @transform_8, window_bounds = array<i64: 400, 784>}, {pipeline_mode = #tpu.pipeline_mode<synchronous>, transform_indices = @transform_9, window_bounds = array<i64: 1, 784>}, {transform_indices = @transform_10, window_bounds = array<i64: 8, 784>}, {transform_indices = @transform_11, window_bounds = array<i64: 8, 40>}]} {
    %c0 = arith.constant 0 : index
    %c0_0 = arith.constant 0 : index
    %0 = vector.load %arg1[%c0, %c0_0] : memref<8x784xbf16, #tpu.memory_space<vmem>>, vector<8x784xbf16>
    %c0_1 = arith.constant 0 : index
    %c0_2 = arith.constant 0 : index
    %1 = vector.load %arg3[%c0_1, %c0_2] : memref<784x400xbf16, #tpu.memory_space<vmem>>, vector<784x400xbf16>
    %cst = arith.constant dense<0.000000e+00> : vector<8x400xf32>
    %2 = tpu.matmul %0, %1, %cst {dimension_numbers = #tpu.dot_dimension_numbers<[1], [0], [0], [1], [0, 0, 1, 1], [], []>} : vector<8x784xbf16>, vector<784x400xbf16>, vector<8x400xf32> -> vector<8x400xf32>
    %c0_3 = arith.constant 0 : index
    %c0_4 = arith.constant 0 : index
    %3 = vector.load %arg4[%c0_3, %c0_4] : memref<1x400xf32, #tpu.memory_space<vmem>>, vector<1x400xf32>
    %4 = vector.broadcast %3 : vector<1x400xf32> to vector<8x400xf32>
    %5 = arith.addf %2, %4 : vector<8x400xf32>
    %cst_5 = arith.constant 0.000000e+00 : f32
    %6 = vector.broadcast %cst_5 : f32 to vector<8x400xf32>
    %7 = arith.maximumf %5, %6 : vector<8x400xf32>
    %8 = arith.truncf %7 : vector<8x400xf32> to vector<8x400xbf16>
    %c0_6 = arith.constant 0 : index
    %c0_7 = arith.constant 0 : index
    %9 = vector.load %arg5[%c0_6, %c0_7] : memref<400x40xbf16, #tpu.memory_space<vmem>>, vector<400x40xbf16>
    %cst_8 = arith.constant dense<0.000000e+00> : vector<8x40xf32>
    %10 = tpu.matmul %8, %9, %cst_8 {dimension_numbers = #tpu.dot_dimension_numbers<[1], [0], [0], [1], [0, 0, 1, 1], [], []>} : vector<8x400xbf16>, vector<400x40xbf16>, vector<8x40xf32> -> vector<8x40xf32>
    %c0_9 = arith.constant 0 : index
    %c0_10 = arith.constant 0 : index
    %11 = vector.load %arg6[%c0_9, %c0_10] : memref<1x40xf32, #tpu.memory_space<vmem>>, vector<1x40xf32>
    %12 = vector.broadcast %11 : vector<1x40xf32> to vector<8x40xf32>
    %13 = arith.addf %10, %12 : vector<8x40xf32>
    %14 = vector.extract_strided_slice %13 {offsets = [0, 0], sizes = [8, 20], strides = [1, 1]} : vector<8x40xf32> to vector<8x20xf32>
    %15 = vector.extract_strided_slice %13 {offsets = [0, 20], sizes = [8, 20], strides = [1, 1]} : vector<8x40xf32> to vector<8x20xf32>
    %c0_11 = arith.constant 0 : index
    %c0_12 = arith.constant 0 : index
    %16 = vector.load %arg2[%c0_11, %c0_12] : memref<8x20xf32, #tpu.memory_space<vmem>>, vector<8x20xf32>
    %cst_13 = arith.constant 5.000000e-01 : f32
    %17 = vector.broadcast %cst_13 : f32 to vector<8x20xf32>
    %18 = arith.mulf %15, %17 : vector<8x20xf32>
    %19 = math.exp %18 : vector<8x20xf32>
    %20 = arith.mulf %16, %19 : vector<8x20xf32>
    %21 = arith.addf %14, %20 : vector<8x20xf32>
    %22 = arith.truncf %21 : vector<8x20xf32> to vector<8x20xbf16>
    %c0_14 = arith.constant 0 : index
    %c0_15 = arith.constant 0 : index
    %23 = vector.load %arg7[%c0_14, %c0_15] : memref<20x400xbf16, #tpu.memory_space<vmem>>, vector<20x400xbf16>
    %cst_16 = arith.constant dense<0.000000e+00> : vector<8x400xf32>
    %24 = tpu.matmul %22, %23, %cst_16 {dimension_numbers = #tpu.dot_dimension_numbers<[1], [0], [0], [1], [0, 0, 1, 1], [], []>} : vector<8x20xbf16>, vector<20x400xbf16>, vector<8x400xf32> -> vector<8x400xf32>
    %c0_17 = arith.constant 0 : index
    %c0_18 = arith.constant 0 : index
    %25 = vector.load %arg8[%c0_17, %c0_18] : memref<1x400xf32, #tpu.memory_space<vmem>>, vector<1x400xf32>
    %26 = vector.broadcast %25 : vector<1x400xf32> to vector<8x400xf32>
    %27 = arith.addf %24, %26 : vector<8x400xf32>
    %cst_19 = arith.constant 0.000000e+00 : f32
    %28 = vector.broadcast %cst_19 : f32 to vector<8x400xf32>
    %29 = arith.maximumf %27, %28 : vector<8x400xf32>
    %30 = arith.truncf %29 : vector<8x400xf32> to vector<8x400xbf16>
    %c0_20 = arith.constant 0 : index
    %c0_21 = arith.constant 0 : index
    %31 = vector.load %arg9[%c0_20, %c0_21] : memref<400x784xbf16, #tpu.memory_space<vmem>>, vector<400x784xbf16>
    %cst_22 = arith.constant dense<0.000000e+00> : vector<8x784xf32>
    %32 = tpu.matmul %30, %31, %cst_22 {dimension_numbers = #tpu.dot_dimension_numbers<[1], [0], [0], [1], [0, 0, 1, 1], [], []>} : vector<8x400xbf16>, vector<400x784xbf16>, vector<8x784xf32> -> vector<8x784xf32>
    %c0_23 = arith.constant 0 : index
    %c0_24 = arith.constant 0 : index
    %33 = vector.load %arg10[%c0_23, %c0_24] : memref<1x784xf32, #tpu.memory_space<vmem>>, vector<1x784xf32>
    %34 = vector.broadcast %33 : vector<1x784xf32> to vector<8x784xf32>
    %35 = arith.addf %32, %34 : vector<8x784xf32>
    %cst_25 = arith.constant 0.000000e+00 : f32
    %36 = vector.broadcast %cst_25 : f32 to vector<8x784xf32>
    %37 = arith.subf %36, %35 : vector<8x784xf32>
    %38 = math.exp %37 : vector<8x784xf32>
    %cst_26 = arith.constant 1.000000e+00 : f32
    %39 = vector.broadcast %cst_26 : f32 to vector<8x784xf32>
    %40 = arith.addf %39, %38 : vector<8x784xf32>
    %41 = tpu.reciprocal %40 {approx = true} : vector<8x784xf32> -> vector<8x784xf32>
    %cst_27 = arith.constant 0.000000e+00 : f32
    %42 = vector.broadcast %cst_27 : f32 to vector<8x784xf32>
    %43 = arith.maximumf %41, %42 : vector<8x784xf32>
    %cst_28 = arith.constant 1.000000e+00 : f32
    %44 = vector.broadcast %cst_28 : f32 to vector<8x784xf32>
    %45 = arith.minimumf %43, %44 : vector<8x784xf32>
    %c0_29 = arith.constant 0 : index
    %c0_30 = arith.constant 0 : index
    %46 = vector.load %arg11[%c0_29, %c0_30] : memref<8x784xf32, #tpu.memory_space<vmem>>, vector<8x784xf32>
    tpu.vector_store %arg11[%c0_29, %c0_30], %45 {strides = array<i32>} : memref<8x784xf32, #tpu.memory_space<vmem>>, vector<8x784xf32>,
    %c0_31 = arith.constant 0 : index
    %c0_32 = arith.constant 0 : index
    %47 = vector.load %arg12[%c0_31, %c0_32] : memref<8x40xf32, #tpu.memory_space<vmem>>, vector<8x40xf32>
    tpu.vector_store %arg12[%c0_31, %c0_32], %13 {strides = array<i32>} : memref<8x40xf32, #tpu.memory_space<vmem>>, vector<8x40xf32>,
    return
  }
  func.func @transform_0(%arg0: i32) -> (i32, i32) {
    %c0_i32 = arith.constant 0 : i32
    %c0_i32_0 = arith.constant 0 : i32
    return %arg0, %c0_i32 : i32, i32
  }
  func.func @transform_1(%arg0: i32) -> (i32, i32) {
    %c0_i32 = arith.constant 0 : i32
    %c0_i32_0 = arith.constant 0 : i32
    return %arg0, %c0_i32 : i32, i32
  }
  func.func @transform_2(%arg0: i32) -> (i32, i32) {
    %c0_i32 = arith.constant 0 : i32
    %c0_i32_0 = arith.constant 0 : i32
    %c0_i32_1 = arith.constant 0 : i32
    return %c0_i32, %c0_i32_0 : i32, i32
  }
  func.func @transform_3(%arg0: i32) -> (i32, i32) {
    %c0_i32 = arith.constant 0 : i32
    %c0_i32_0 = arith.constant 0 : i32
    %c0_i32_1 = arith.constant 0 : i32
    return %c0_i32, %c0_i32_0 : i32, i32
  }
  func.func @transform_4(%arg0: i32) -> (i32, i32) {
    %c0_i32 = arith.constant 0 : i32
    %c0_i32_0 = arith.constant 0 : i32
    %c0_i32_1 = arith.constant 0 : i32
    return %c0_i32, %c0_i32_0 : i32, i32
  }
  func.func @transform_5(%arg0: i32) -> (i32, i32) {
    %c0_i32 = arith.constant 0 : i32
    %c0_i32_0 = arith.constant 0 : i32
    %c0_i32_1 = arith.constant 0 : i32
    return %c0_i32, %c0_i32_0 : i32, i32
  }
  func.func @transform_6(%arg0: i32) -> (i32, i32) {
    %c0_i32 = arith.constant 0 : i32
    %c0_i32_0 = arith.constant 0 : i32
    %c0_i32_1 = arith.constant 0 : i32
    return %c0_i32, %c0_i32_0 : i32, i32
  }
  func.func @transform_7(%arg0: i32) -> (i32, i32) {
    %c0_i32 = arith.constant 0 : i32
    %c0_i32_0 = arith.constant 0 : i32
    %c0_i32_1 = arith.constant 0 : i32
    return %c0_i32, %c0_i32_0 : i32, i32
  }
  func.func @transform_8(%arg0: i32) -> (i32, i32) {
    %c0_i32 = arith.constant 0 : i32
    %c0_i32_0 = arith.constant 0 : i32
    %c0_i32_1 = arith.constant 0 : i32
    return %c0_i32, %c0_i32_0 : i32, i32
  }
  func.func @transform_9(%arg0: i32) -> (i32, i32) {
    %c0_i32 = arith.constant 0 : i32
    %c0_i32_0 = arith.constant 0 : i32
    %c0_i32_1 = arith.constant 0 : i32
    return %c0_i32, %c0_i32_0 : i32, i32
  }
  func.func @transform_10(%arg0: i32) -> (i32, i32) {
    %c0_i32 = arith.constant 0 : i32
    %c0_i32_0 = arith.constant 0 : i32
    return %arg0, %c0_i32 : i32, i32
  }
  func.func @transform_11(%arg0: i32) -> (i32, i32) {
    %c0_i32 = arith.constant 0 : i32
    %c0_i32_0 = arith.constant 0 : i32
    return %arg0, %c0_i32 : i32, i32
  }
}

</mosaic_0001>

<bundles_post_ra>
// kernel: tpu_custom_call.1
= control target key start
LH: loop header
LB: loop body
LE: loop exit
PB: predicated region body
PF: predicated region fallthrough
CT: control target
= control target key end

     0   :  { %s6952_s0 = inlined_call_operand.vmem [shape: bf16[16,784], index: 0, kind: input, shape index: {}]   ;;  %s6953_s1 = inlined_call_operand.vmem [shape: f32[16,20], index: 1, kind: input, shape index: {}]   ;;  %s6954_s2 = inlined_call_operand.vmem [shape: bf16[784,400], index: 2, kind: input, shape index: {}]   ;;  %s6955_s3 = inlined_call_operand.vmem [shape: f32[1,400], index: 3, kind: input, shape index: {}]   ;;  %s6956_s4 = inlined_call_operand.vmem [shape: bf16[400,40], index: 4, kind: input, shape index: {}]   ;;  %s6957_s5 = inlined_call_operand.vmem [shape: f32[1,40], index: 5, kind: input, shape index: {}]   ;;  %s6958_s6 = inlined_call_operand.vmem [shape: bf16[20,400], index: 6, kind: input, shape index: {}]   ;;  %s6959_s7 = inlined_call_operand.vmem [shape: f32[1,400], index: 7, kind: input, shape index: {}]   ;;  %s6960_s8 = inlined_call_operand.vmem [shape: bf16[400,784], index: 8, kind: input, shape index: {}]   ;;  %s6961_s9 = inlined_call_operand.vmem [shape: f32[1,784], index: 9, kind: input, shape index: {}]   ;;  %s6962_s10 = inlined_call_operand.hbm [shape: f32[16,784], index: 10, kind: output, shape index: {0}]   ;;  %s6963_s11 = inlined_call_operand.hbm [shape: f32[16,40], index: 11, kind: output, shape index: {1}]  }
   0x1   :  { %6965 = sst [smem:[#allocation10_spill]] %s6952_s0 }
   0x2   :  { %17 = vsyncpa [#allocation3], 0 }
   0x3   :  { %19 = vsyncpa [#allocation3 + $0x1], 0 }
   0x4   :  { %20 = vsyncpa [#allocation5], 0 }
   0x5   :  { %22 = vsyncpa [#allocation5 + $0x1], 0  ;;  %s5455_s17 = smov 0   ;;  %s5457_s18 = smov 0  }
   0x6   :  { %s5459_s19 = smov 0   ;;  %s5461_s20 = smov 0  }
   0x7 LB: > { %6966 = sst [smem:[#allocation8_spill]] %s5385_s19  ;;  %s5476_s21 = sadd.s32 4294967295, %s5389_s20   ;;  %s5389_s20 = sphi %s5461_s20, %s6975_s20   ;;  %s5385_s19 = sphi %s5459_s19, %s6972_s19   ;;  %s5381_s18 = sphi %s5457_s18, %s6974_s18   ;;  %s5377_s17 = sphi %s5455_s17, %s6973_s17  }
   0x8   : > { %s4106_s22 = sadd.s32 4294967294, %s5389_s20   ;;  %s5480_s23 = sadd.s32 1, %s5389_s20  }
   0x9   : > { %s255_s24 = sadd.s32 1, %s5385_s19  ;;  %s252_s25 = ssub.s32 %s5389_s20, %s5480_s23 }
   0xa   : > { %p265_p0 = scmp.ne.s32.totalorder %s5385_s19, %s5381_s18  ;;  %p253_p1 = scmp.eq.s32.totalorder %s252_s25, 0 }
   0xb   : > { %p266_p2 = scmp.eq.s32.totalorder %s5476_s21, 1  ;;  %p271_p3 = scmp.ne.s32.totalorder %s5381_s18, %s5377_s17 }
   0xc   : > { %p272_p4 = scmp.eq.s32.totalorder %s4106_s22, 1  ;;  %p4109_p7 = scmp.ge.s32.totalorder %s5389_s20, 1 }
   0xd   : > { %s5491_s26 = scalar_select %p253_p1, %s5385_s19, %s255_s24  }
   0xe   : > { %p5493_p5 = por %p266_p2, %p265_p0  ;;  %p5497_p6 = por %p272_p4, %p271_p3 }
   0xf   : > { %6967 = sst [smem:[#allocation9_spill]] %s5491_s26  ;;  %p355_p8 = scmp.lt.s32.totalorder %s5389_s20, 3 }
  0x11   : > { %p356_p9 = pnand %p4109_p7, %p355_p8 }
  0x12   : > { %v4678_v0 = vld [vmem:[%s6954_s2 + $0x4] ss:$16 sps:$4 sm:$0xff] (!%p356_p9)   ;;  %p404_p10 = scmp.lt.s32.totalorder (!%p356_p9), %s5476_s21, 1  ;;  %v4680_v1 = vld [vmem:[%s6954_s2] ss:$16 sps:$4 sm:$0xff] (!%p356_p9)   ;;  %v5391_v2 = vmov (!%p356_p9), 0  }
  0x13   : > { %359 = sbr.rel (%p356_p9) target bundleno = 1423 (0x58f), region = 60  ;;  %1799 = vmatprep.mubr.bf16.mxu1 (!%p356_p9), %v5391_v2  ;;  %1644 = vmatprep.subr.bf16.mxu0 (!%p356_p9), %v4678_v0  ;;  %v4681_v3 = vld [vmem:[%s6954_s2 + $0x604] ss:$16 sps:$4 sm:$0xff] (!%p356_p9)   ;;  %v4683_v4 = vld [vmem:[%s6954_s2 + $0x600] ss:$16 sps:$4 sm:$0xff] (!%p356_p9)   ;;  %s6970_s0 = sld [smem:[#allocation10_spill]] (!%p356_p9) }
  0x14   : > { %1645 = vmatpush1.bf16.msra.mxu0 (!%p356_p9), %v4680_v1  ;;  %v4684_v5 = vld [vmem:[%s6954_s2 + $0x24] ss:$16 sps:$4 sm:$0xff] (!%p356_p9)   ;;  %v4686_v6 = vld [vmem:[%s6954_s2 + $0x20] ss:$16 sps:$4 sm:$0xff] (!%p356_p9)   ;;  %1767 = vmatprep.subr.bf16.mxu1 (!%p356_p9), %v4681_v3  ;;  %v4687_v7 = vld [vmem:[%s6954_s2 + $0x8] ss:$16 sps:$4 sm:$0xff] (!%p356_p9)  }
  0x15   : > { %1768 = vmatpush1.bf16.msra.mxu1 (!%p356_p9), %v4683_v4  ;;  %1646 = vmatprep.subr.bf16.mxu0 (!%p356_p9), %v4684_v5  ;;  %v4689_v8 = vld [vmem:[%s6954_s2 + $0xc] ss:$16 sps:$4 sm:$0xff] (!%p356_p9)   ;;  %vm1640_vm0 = vcmask (!%p356_p9), 130048   ;;  %v4691_v9 = vld [vmem:[%s6954_s2 + $0x44] ss:$16 sps:$4 sm:$0xff] (!%p356_p9)   ;;  %s6236_s22 = sand.u32 (!%p356_p9), 1, %s5381_s18  }
  0x16   : > { %v4693_v10 = vld [vmem:[%s6954_s2 + $0x40] ss:$16 sps:$4 sm:$0xff] (!%p356_p9)   ;;  %1808 = vmatprep.subr.bf16.mxu1 (!%p356_p9), %v4689_v8  ;;  %v4696_v12 = vld [vmem:[%s6954_s2 + $0x2c] ss:$16 sps:$4 sm:$0xff] (!%p356_p9)   ;;  %v4694_v13 = vld [vmem:[%s6954_s2 + $0x28] ss:$16 sps:$4 sm:$0xff] (!%p356_p9)  }
  0x17   : > { %v4697_v14 = vld [vmem:[%s6954_s2 + $0x64] ss:$16 sps:$4 sm:$0xff] (!%p356_p9)   ;;  %v4699_v15 = vld [vmem:[%s6954_s2 + $0x60] ss:$16 sps:$4 sm:$0xff] (!%p356_p9)   ;;  %v4702_v16 = vld [vmem:[%s6954_s2 + $0x4c] ss:$16 sps:$4 sm:$0xff] (!%p356_p9)  }
  0x18   : > { %1647 = vmatpush1.bf16.msra.mxu0 (!%p356_p9), %v4686_v6  ;;  %v4703_v17 = vld [vmem:[%s6954_s2 + $0x84] ss:$16 sps:$4 sm:$0xff] (!%p356_p9)   ;;  %v4700_v18 = vld [vmem:[%s6954_s2 + $0x48] ss:$16 sps:$4 sm:$0xff] (!%p356_p9)   ;;  %v4705_v19 = vld [vmem:[%s6954_s2 + $0x80] ss:$16 sps:$4 sm:$0xff] (!%p356_p9)  }
  0x19   : > { %1648 = vmatprep.subr.bf16.mxu0 (!%p356_p9), %v4691_v9  ;;  %v4708_v20 = vld [vmem:[%s6954_s2 + $0x6c] ss:$16 sps:$4 sm:$0xff] (!%p356_p9)   ;;  %v4709_v21 = vld [vmem:[%s6954_s2 + $0xa4] ss:$16 sps:$4 sm:$0xff] (!%p356_p9)   ;;  %v4706_v22 = vld [vmem:[%s6954_s2 + $0x68] ss:$16 sps:$4 sm:$0xff] (!%p356_p9)  }
  0x1a   : > { %s5518_s24 = scalar_select %p404_p10, %s5476_s21, 1  ;;  %v4711_v23 = vld [vmem:[%s6954_s2 + $0xa0] ss:$16 sps:$4 sm:$0xff]   ;;  %v4714_v24 = vld [vmem:[%s6954_s2 + $0x8c] ss:$16 sps:$4 sm:$0xff]   ;;  %vm3968_vm1 = vcmask 326656  }
  0x1b   : > { %v4715_v25 = vld [vmem:[%s6954_s2 + $0xc4] ss:$16 sps:$4 sm:$0xff]   ;;  %v4712_v26 = vld [vmem:[%s6954_s2 + $0x88] ss:$16 sps:$4 sm:$0xff]   ;;  %v4717_v27 = vld [vmem:[%s6954_s2 + $0xc0] ss:$16 sps:$4 sm:$0xff]  }
  0x1c   : > { %s4630_s15 = smul.u32 28, %s5518_s24  ;;  %1649 = vmatpush1.bf16.msra.mxu0 %v4693_v10  ;;  %v4720_v28 = vld [vmem:[%s6954_s2 + $0xac] ss:$16 sps:$4 sm:$0xff]   ;;  %v4721_v29 = vld [vmem:[%s6954_s2 + $0xe4] ss:$16 sps:$4 sm:$0xff]   ;;  %s4110_s12 = sshll.u32 %s6236_s22, 3 }
  0x1d   : > { %1650 = vmatprep.subr.bf16.mxu0 %v4697_v14  ;;  %v4718_v30 = vld [vmem:[%s6954_s2 + $0xa8] ss:$16 sps:$4 sm:$0xff]   ;;  %v4723_v31 = vld [vmem:[%s6954_s2 + $0xe0] ss:$16 sps:$4 sm:$0xff]   ;;  %v4726_v32 = vld [vmem:[%s6954_s2 + $0xcc] ss:$16 sps:$4 sm:$0xff]  }
  0x1e   : > { %s5536_s25 = scalar_lea.vmem %s6970_s0, %s4630_s15  ;;  %v4727_v33 = vld [vmem:[%s6954_s2 + $0x104] ss:$16 sps:$4 sm:$0xff]   ;;  %v4724_v34 = vld [vmem:[%s6954_s2 + $0xc8] ss:$16 sps:$4 sm:$0xff]   ;;  %v4729_v35 = vld [vmem:[%s6954_s2 + $0x100] ss:$16 sps:$4 sm:$0xff]  }
  0x1f   : > { %v4690_v11 = vld [vmem:[%s5536_s25 + $0x18] ss:$0 sps:$4 sm:$0xff]   ;;  %v4732_v36 = vld [vmem:[%s6954_s2 + $0xec] ss:$16 sps:$4 sm:$0xff]   ;;  %v4733_v37 = vld [vmem:[%s6954_s2 + $0x124] ss:$16 sps:$4 sm:$0xff]  }
  0x20   : > { %4316 = vmatmul.mubr.msk.bf16.vlgmr.msra.gmra.mrb[0].mxu1 %vm1640_vm0, %v4690_v11  ;;  %1651 = vmatpush1.bf16.msra.mxu0 %v4699_v15  ;;  %v4730_v38 = vld [vmem:[%s6954_s2 + $0xe8] ss:$16 sps:$4 sm:$0xff]   ;;  %v4735_v39 = vld [vmem:[%s6954_s2 + $0x120] ss:$16 sps:$4 sm:$0xff]   ;;  %v4738_v40 = vld [vmem:[%s6954_s2 + $0x10c] ss:$16 sps:$4 sm:$0xff]  }
  0x21   : > { %1809 = vmatpush1.bf16.msra.mxu1 %v4687_v7  ;;  %1652 = vmatprep.subr.bf16.mxu0 %v4703_v17  ;;  %v4739_v41 = vld [vmem:[%s6954_s2 + $0x144] ss:$16 sps:$4 sm:$0xff]   ;;  %v4736_v42 = vld [vmem:[%s6954_s2 + $0x108] ss:$16 sps:$4 sm:$0xff]   ;;  %v4741_v43 = vld [vmem:[%s6954_s2 + $0x140] ss:$16 sps:$4 sm:$0xff]  }
  0x22   : > { %1810 = vmatprep.subr.bf16.mxu1 %v4696_v12  ;;  %v4744_v44 = vld [vmem:[%s6954_s2 + $0x12c] ss:$16 sps:$4 sm:$0xff]   ;;  %v4745_v45 = vld [vmem:[%s6954_s2 + $0x164] ss:$16 sps:$4 sm:$0xff]   ;;  %v4742_v46 = vld [vmem:[%s6954_s2 + $0x128] ss:$16 sps:$4 sm:$0xff]  }
  0x23   : > { %v4747_v47 = vld [vmem:[%s6954_s2 + $0x160] ss:$16 sps:$4 sm:$0xff]   ;;  %v4750_v48 = vld [vmem:[%s6954_s2 + $0x14c] ss:$16 sps:$4 sm:$0xff]   ;;  %v4751_v50 = vld [vmem:[%s6954_s2 + $0x184] ss:$16 sps:$4 sm:$0xff]  }
  0x24   : > { %1653 = vmatpush1.bf16.msra.mxu0 %v4705_v19  ;;  %v414_v49 = vld [vmem:[%s5536_s25] sm:$0xff]  ;;  %v4748_v52 = vld [vmem:[%s6954_s2 + $0x148] ss:$16 sps:$4 sm:$0xff]   ;;  %v4756_v54 = vld [vmem:[%s6954_s2 + $0x16c] ss:$16 sps:$4 sm:$0xff]   ;;  %s6245_s13 = scalar_lea.vmem [#allocation4], %s4110_s12 }
  0x25   : > { %1811 = vmatpush1.bf16.msra.mxu1 %v4694_v13  ;;  %1654 = vmatprep.subr.bf16.mxu0 %v4709_v21  ;;  %v4114_v51 = vcombine.high %v414_v49, %v414_v49  ;;  %v4753_v53 = vld [vmem:[%s6954_s2 + $0x180] ss:$16 sps:$4 sm:$0xff]   ;;  %v4757_v55 = vld [vmem:[%s6954_s2 + $0x1a4] ss:$16 sps:$4 sm:$0xff]   ;;  %v4754_v56 = vld [vmem:[%s6954_s2 + $0x168] ss:$16 sps:$4 sm:$0xff]   ;;  %v4113_v6 = vcombine.low %v414_v49, %v414_v49 }
  0x26   : > { %1812 = vmatprep.subr.bf16.mxu1 %v4702_v16  ;;  %v4759_v57 = vld [vmem:[%s6954_s2 + $0x1a0] ss:$16 sps:$4 sm:$0xff]   ;;  %v4762_v58 = vld [vmem:[%s6954_s2 + $0x18c] ss:$16 sps:$4 sm:$0xff]   ;;  %v4763_v59 = vld [vmem:[%s6954_s2 + $0x1c4] ss:$16 sps:$4 sm:$0xff]  }
  0x27   : > { %1676 = vmatprep.mubr.bf16.mxu0 %v4114_v51  ;;  %1840 = vmatprep.mubr.bf16.mxu1 %v4114_v51  ;;  %v4760_v60 = vld [vmem:[%s6954_s2 + $0x188] ss:$16 sps:$4 sm:$0xff]   ;;  %v4765_v61 = vld [vmem:[%s6954_s2 + $0x1c0] ss:$16 sps:$4 sm:$0xff]   ;;  %v4768_v62 = vld [vmem:[%s6954_s2 + $0x1ac] ss:$16 sps:$4 sm:$0xff]  }
  0x28   : > { %1655 = vmatpush1.bf16.msra.mxu0 %v4711_v23  ;;  %v4769_v63 = vld [vmem:[%s6954_s2 + $0x1e4] ss:$16 sps:$4 sm:$0xff]   ;;  %v4766_v0 = vld [vmem:[%s6954_s2 + $0x1a8] ss:$16 sps:$4 sm:$0xff]   ;;  %v4771_v1 = vld [vmem:[%s6954_s2 + $0x1e0] ss:$16 sps:$4 sm:$0xff]  }
  0x29   : > { %1813 = vmatpush1.bf16.msra.mxu1 %v4700_v18  ;;  %1656 = vmatprep.subr.bf16.mxu0 %v4715_v25  ;;  %v4774_v3 = vld [vmem:[%s6954_s2 + $0x1cc] ss:$16 sps:$4 sm:$0xff]   ;;  %v4779_v4 = vld [vmem:[%s6954_s2 + $0x204] ss:$16 sps:$4 sm:$0xff]   ;;  %v4772_v5 = vld [vmem:[%s6954_s2 + $0x1c8] ss:$16 sps:$4 sm:$0xff]  }
  0x2a   : > { %1814 = vmatprep.subr.bf16.mxu1 %v4708_v20  ;;  %v4777_v7 = vld [vmem:[%s6954_s2 + $0x200] ss:$16 sps:$4 sm:$0xff]   ;;  %v4782_v8 = vld [vmem:[%s6954_s2 + $0x1ec] ss:$16 sps:$4 sm:$0xff]   ;;  %v4785_v9 = vld [vmem:[%s6954_s2 + $0x224] ss:$16 sps:$4 sm:$0xff]  }
  0x2b   : > { %v4780_v10 = vld [vmem:[%s6954_s2 + $0x1e8] ss:$16 sps:$4 sm:$0xff]   ;;  %v4783_v11 = vld [vmem:[%s6954_s2 + $0x220] ss:$16 sps:$4 sm:$0xff]   ;;  %v4788_v12 = vld [vmem:[%s6954_s2 + $0x20c] ss:$16 sps:$4 sm:$0xff]  }
  0x2c   : > { %1657 = vmatpush1.bf16.msra.mxu0 %v4717_v27  ;;  %v4791_v13 = vld [vmem:[%s6954_s2 + $0x244] ss:$16 sps:$4 sm:$0xff]   ;;  %v4786_v14 = vld [vmem:[%s6954_s2 + $0x208] ss:$16 sps:$4 sm:$0xff]   ;;  %v4789_v15 = vld [vmem:[%s6954_s2 + $0x240] ss:$16 sps:$4 sm:$0xff]  }
  0x2d   : > { %1815 = vmatpush1.bf16.msra.mxu1 %v4706_v22  ;;  %1658 = vmatprep.subr.bf16.mxu0 %v4721_v29  ;;  %v4794_v16 = vld [vmem:[%s6954_s2 + $0x22c] ss:$16 sps:$4 sm:$0xff]   ;;  %v4797_v17 = vld [vmem:[%s6954_s2 + $0x264] ss:$16 sps:$4 sm:$0xff]   ;;  %v4792_v18 = vld [vmem:[%s6954_s2 + $0x228] ss:$16 sps:$4 sm:$0xff]  }
  0x2e   : > { %1816 = vmatprep.subr.bf16.mxu1 %v4714_v24  ;;  %v4795_v19 = vld [vmem:[%s6954_s2 + $0x260] ss:$16 sps:$4 sm:$0xff]   ;;  %v4800_v20 = vld [vmem:[%s6954_s2 + $0x24c] ss:$16 sps:$4 sm:$0xff]   ;;  %v4803_v21 = vld [vmem:[%s6954_s2 + $0x284] ss:$16 sps:$4 sm:$0xff]  }
  0x2f   : > { %v4798_v22 = vld [vmem:[%s6954_s2 + $0x248] ss:$16 sps:$4 sm:$0xff]   ;;  %v4801_v23 = vld [vmem:[%s6954_s2 + $0x280] ss:$16 sps:$4 sm:$0xff]   ;;  %v4806_v24 = vld [vmem:[%s6954_s2 + $0x26c] ss:$16 sps:$4 sm:$0xff]  }
  0x30   : > { %1659 = vmatpush1.bf16.msra.mxu0 %v4723_v31  ;;  %v4809_v25 = vld [vmem:[%s6954_s2 + $0x2a4] ss:$16 sps:$4 sm:$0xff]   ;;  %v4807_v27 = vld [vmem:[%s6954_s2 + $0x2a0] ss:$16 sps:$4 sm:$0xff]   ;;  %v5785_v31 = vld [vmem:[%s5536_s25 + $0x8] sm:$0xff]  ;;  %vm2343_vm2 = vcmask 1041408  }
  0x31   : > { %1817 = vmatpush1.bf16.msra.mxu1 %v4712_v26  ;;  %1660 = vmatprep.subr.bf16.mxu0 %v4727_v33  ;;  %v4804_v26 = vld [vmem:[%s6954_s2 + $0x268] ss:$16 sps:$4 sm:$0xff]   ;;  %v4815_v29 = vld [vmem:[%s6954_s2 + $0x2c4] ss:$16 sps:$4 sm:$0xff]   ;;  %v4818_v33 = vld [vmem:[%s6954_s2 + $0x2ac] ss:$16 sps:$4 sm:$0xff]  }
  0x32   : > { %1818 = vmatprep.subr.bf16.mxu1 %v4720_v28  ;;  %v4812_v28 = vld [vmem:[%s6954_s2 + $0x28c] ss:$16 sps:$4 sm:$0xff]   ;;  %v4837_v49 = vld [vmem:[%s6954_s2 + $0x340] ss:$16 sps:$4 sm:$0xff]   ;;  %v4845_v51 = vld [vmem:[%s6954_s2 + $0x364] ss:$16 sps:$4 sm:$0xff]  }
  0x33   : > { %s5392_s26 = smov 108   ;;  %vm2339_vm3 = vcmask 162816   ;;  %s4538_s14 = sshll.u32 %s5476_s21, 7 }
  0x34   : > { %1661 = vmatpush1.bf16.msra.mxu0 %v4729_v35  ;;  %v4821_v35 = vld [vmem:[%s6954_s2 + $0x2e4] ss:$16 sps:$4 sm:$0xff]   ;;  %s4003_s16 = sshll.u32 %s6245_s13, 4  ;;  %s6867_s0 = scalar_lea.hbm %s6963_s11, %s4538_s14  ;;  %s4004_s16 = int_to_ptr.vmem [resolvable:$true] %s4003_s16 }
  0x35   : > { %1819 = vmatpush1.bf16.msra.mxu1 %v4718_v30  ;;  %1662 = vmatprep.subr.bf16.mxu0 %v4733_v37  ;;  %v4810_v30 = vld [vmem:[%s6954_s2 + $0x288] ss:$16 sps:$4 sm:$0xff]   ;;  %v4819_v37 = vld [vmem:[%s6954_s2 + $0x2e0] ss:$16 sps:$4 sm:$0xff]   ;;  %s5295_s15 = scalar_lea.vmem %s4004_s16, 128  ;;  %s5393_s29 = smov [#allocation4]  }
  0x36   : > { %1820 = vmatprep.subr.bf16.mxu1 %v4726_v32  ;;  %v4813_v32 = vld [vmem:[%s6954_s2 + $0x2c0] ss:$16 sps:$4 sm:$0xff]   ;;  %p5296_p11 = scmp.ne.s32.totalorder %s4004_s16, %s5295_s15  ;;  %s5299_s30 = sshll.u32 %s5393_s29, 4  ;;  %s5300_s30 = int_to_ptr.vmem [resolvable:$false] %s5299_s30 }
  0x37   : > { %s5301_s12 = scalar_lea.vmem %s5300_s30, 256  ;;  %p5302_p0 = scmp.lt.s32.totalorder %s4004_s16, %s5300_s30 }
  0x38   : > { %1663 = vmatpush1.bf16.msra.mxu0 %v4735_v39  ;;  %v4827_v39 = vld [vmem:[%s6954_s2 + $0x304] ss:$16 sps:$4 sm:$0xff]   ;;  %p5297_p12 = pnand %p5296_p11, %p5493_p5  ;;  %p5303_p1 = scmp.lt.s32.totalorder %s5301_s12, %s5295_s15 }
  0x39   : > { %1821 = vmatpush1.bf16.msra.mxu1 %v4724_v34  ;;  %1664 = vmatprep.subr.bf16.mxu0 %v4739_v41  ;;  %v4116_v34 = vcombine.high %v5785_v31, %v5785_v31  ;;  %v4825_v41 = vld [vmem:[%s6954_s2 + $0x300] ss:$16 sps:$4 sm:$0xff]  }
  0x3a   : > { %1822 = vmatprep.subr.bf16.mxu1 %v4732_v36  ;;  %v4816_v36 = vld [vmem:[%s6954_s2 + $0x2a8] ss:$16 sps:$4 sm:$0xff]   ;;  %p5298_p13 = pneg %p5297_p12  ;;  %p5304_p2 = por %p5303_p1, %p5302_p0 }
  0x3c   : > { %1665 = vmatpush1.bf16.msra.mxu0 %v4741_v43  ;;  %v4833_v43 = vld [vmem:[%s6954_s2 + $0x324] ss:$16 sps:$4 sm:$0xff]   ;;  %p5305_p3 = pnand %p5304_p2, %p5298_p13 }
  0x3d   : > { %1823 = vmatpush1.bf16.msra.mxu1 %v4730_v38  ;;  %1666 = vmatprep.subr.bf16.mxu0 %v4745_v45  ;;  %v4824_v38 = vld [vmem:[%s6954_s2 + $0x2cc] ss:$16 sps:$4 sm:$0xff]   ;;  %v4831_v45 = vld [vmem:[%s6954_s2 + $0x320] ss:$16 sps:$4 sm:$0xff]  }
  0x3e   : > { %1824 = vmatprep.subr.bf16.mxu1 %v4738_v40  ;;  %v4822_v40 = vld [vmem:[%s6954_s2 + $0x2c8] ss:$16 sps:$4 sm:$0xff]  }
  0x40   : > { %1667 = vmatpush1.bf16.msra.mxu0 %v4747_v47  ;;  %v4839_v47 = vld [vmem:[%s6954_s2 + $0x344] ss:$16 sps:$4 sm:$0xff]  }
  0x41   : > { %1825 = vmatpush1.bf16.msra.mxu1 %v4736_v42  ;;  %1668 = vmatprep.subr.bf16.mxu0 %v4751_v50  ;;  %v4830_v42 = vld [vmem:[%s6954_s2 + $0x2ec] ss:$16 sps:$4 sm:$0xff]  }
  0x42   : > { %1826 = vmatprep.subr.bf16.mxu1 %v4744_v44  ;;  %v4828_v44 = vld [vmem:[%s6954_s2 + $0x2e8] ss:$16 sps:$4 sm:$0xff]   ;;  %v4842_v50 = vld [vmem:[%s6954_s2 + $0x32c] ss:$16 sps:$4 sm:$0xff]  }
  0x44   : > { %1669 = vmatpush1.bf16.msra.mxu0 %v4753_v53  ;;  %v4843_v53 = vld [vmem:[%s6954_s2 + $0x360] ss:$16 sps:$4 sm:$0xff]  }
  0x45   : > { %1827 = vmatpush1.bf16.msra.mxu1 %v4742_v46  ;;  %1670 = vmatprep.subr.bf16.mxu0 %v4757_v55  ;;  %v4836_v46 = vld [vmem:[%s6954_s2 + $0x30c] ss:$16 sps:$4 sm:$0xff]   ;;  %v4851_v55 = vld [vmem:[%s6954_s2 + $0x384] ss:$16 sps:$4 sm:$0xff]  }
  0x46   : > { %1828 = vmatprep.subr.bf16.mxu1 %v4750_v48  ;;  %v4834_v48 = vld [vmem:[%s6954_s2 + $0x308] ss:$16 sps:$4 sm:$0xff]  }
  0x48   : > { %1671 = vmatpush1.bf16.msra.mxu0 %v4759_v57  ;;  %v4849_v57 = vld [vmem:[%s6954_s2 + $0x380] ss:$16 sps:$4 sm:$0xff]  }
  0x49   : > { %1829 = vmatpush1.bf16.msra.mxu1 %v4748_v52  ;;  %1672 = vmatprep.subr.bf16.mxu0 %v4763_v59  ;;  %v4840_v52 = vld [vmem:[%s6954_s2 + $0x328] ss:$16 sps:$4 sm:$0xff]   ;;  %v4857_v59 = vld [vmem:[%s6954_s2 + $0x3a4] ss:$16 sps:$4 sm:$0xff]  }
  0x4a   : > { %1830 = vmatprep.subr.bf16.mxu1 %v4756_v54  ;;  %v4848_v54 = vld [vmem:[%s6954_s2 + $0x34c] ss:$16 sps:$4 sm:$0xff]  }
  0x4c   : > { %1673 = vmatpush1.bf16.msra.mxu0 %v4765_v61  ;;  %v4855_v61 = vld [vmem:[%s6954_s2 + $0x3a0] ss:$16 sps:$4 sm:$0xff]  }
  0x4d   : > { %1831 = vmatpush1.bf16.msra.mxu1 %v4754_v56  ;;  %1674 = vmatprep.subr.bf16.mxu0 %v4769_v63  ;;  %v4846_v56 = vld [vmem:[%s6954_s2 + $0x348] ss:$16 sps:$4 sm:$0xff]   ;;  %v4863_v63 = vld [vmem:[%s6954_s2 + $0x3c4] ss:$16 sps:$4 sm:$0xff]  }
  0x4e   : > { %1832 = vmatprep.subr.bf16.mxu1 %v4762_v58  ;;  %v4854_v58 = vld [vmem:[%s6954_s2 + $0x36c] ss:$16 sps:$4 sm:$0xff]  }
  0x50   : > { %1675 = vmatpush1.bf16.msra.mxu0 %v4771_v1  ;;  %v4861_v1 = vld [vmem:[%s6954_s2 + $0x3c0] ss:$16 sps:$4 sm:$0xff]  }
  0x51   : > { %1833 = vmatpush1.bf16.msra.mxu1 %v4760_v60  ;;  %1685 = vmatprep.subr.bf16.mxu0 %v4779_v4  ;;  %v4852_v60 = vld [vmem:[%s6954_s2 + $0x368] ss:$16 sps:$4 sm:$0xff]   ;;  %v4869_v4 = vld [vmem:[%s6954_s2 + $0x3e4] ss:$16 sps:$4 sm:$0xff]  }
  0x52   : > { %1834 = vmatprep.subr.bf16.mxu1 %v4768_v62  ;;  %v4860_v62 = vld [vmem:[%s6954_s2 + $0x38c] ss:$16 sps:$4 sm:$0xff]  }
  0x53   : > { %1677 = vmatmul.mubr.bf16.vlgmr.msra.gmra.mrb[0].mxu0 %v4113_v6 }
  0x54   : > { %1686 = vmatpush1.bf16.msra.mxu0 %v4777_v7  ;;  %1717 = vmatprep.mubr.bf16.mxu0 %v4116_v34  ;;  %v4872_v7 = vld [vmem:[%s6954_s2 + $0x3cc] ss:$16 sps:$4 sm:$0xff]  }
  0x55   : > { %1835 = vmatpush1.bf16.msra.mxu1 %v4766_v0  ;;  %1687 = vmatprep.subr.bf16.mxu0 %v4785_v9  ;;  %v4858_v0 = vld [vmem:[%s6954_s2 + $0x388] ss:$16 sps:$4 sm:$0xff]  }
  0x56   : > { %1836 = vmatprep.subr.bf16.mxu1 %v4774_v3  ;;  %v4866_v3 = vld [vmem:[%s6954_s2 + $0x3ac] ss:$16 sps:$4 sm:$0xff]   ;;  %v4870_v9 = vld [vmem:[%s6954_s2 + $0x3c8] ss:$16 sps:$4 sm:$0xff]  }
  0x58   : > { %1688 = vmatpush1.bf16.msra.mxu0 %v4783_v11  ;;  %v4875_v11 = vld [vmem:[%s6954_s2 + $0x400] ss:$16 sps:$4 sm:$0xff]  }
  0x59   : > { %1837 = vmatpush1.bf16.msra.mxu1 %v4772_v5  ;;  %1689 = vmatprep.subr.bf16.mxu0 %v4791_v13  ;;  %v4864_v5 = vld [vmem:[%s6954_s2 + $0x3a8] ss:$16 sps:$4 sm:$0xff]   ;;  %v4883_v13 = vld [vmem:[%s6954_s2 + $0x424] ss:$16 sps:$4 sm:$0xff]  }
  0x5a   : > { %1838 = vmatprep.subr.bf16.mxu1 %v4782_v8  ;;  %v4877_v8 = vld [vmem:[%s6954_s2 + $0x404] ss:$16 sps:$4 sm:$0xff]  }
  0x5c   : > { %1690 = vmatpush1.bf16.msra.mxu0 %v4789_v15  ;;  %v4878_v15 = vld [vmem:[%s6954_s2 + $0x3e8] ss:$16 sps:$4 sm:$0xff]  }
  0x5d   : > { %1839 = vmatpush1.bf16.msra.mxu1 %v4780_v10  ;;  %1691 = vmatprep.subr.bf16.mxu0 %v4797_v17  ;;  %v4115_v10 = vcombine.low %v5785_v31, %v5785_v31  ;;  %v4902_v31 = vld [vmem:[%s6954_s2 + $0x468] ss:$16 sps:$4 sm:$0xff]  }
  0x5e   : > { %1849 = vmatprep.subr.bf16.mxu1 %v4788_v12  ;;  %v4880_v12 = vld [vmem:[%s6954_s2 + $0x3ec] ss:$16 sps:$4 sm:$0xff]  }
  0x60   : > { %1841 = vmatmul.mubr.bf16.vlgmr.msra.gmra.mrb[4].mxu1 %v4113_v6  ;;  %1692 = vmatpush1.bf16.msra.mxu0 %v4795_v19  ;;  %v4867_v6 = vld [vmem:[%s6954_s2 + $0x3e0] ss:$16 sps:$4 sm:$0xff]   ;;  %v4889_v19 = vld [vmem:[%s6954_s2 + $0x444] ss:$16 sps:$4 sm:$0xff]  }
  0x61   : > { %1850 = vmatpush1.bf16.msra.mxu1 %v4786_v14  ;;  %1693 = vmatprep.subr.bf16.mxu0 %v4803_v21  ;;  %v5921_v14 = vld [vmem:[%s5536_s25 + $0x10] sm:$0xff] }
  0x62   : > { %1851 = vmatprep.subr.bf16.mxu1 %v4794_v16  ;;  %1881 = vmatprep.mubr.bf16.mxu1 %v4116_v34  ;;  %v4881_v16 = vld [vmem:[%s6954_s2 + $0x420] ss:$16 sps:$4 sm:$0xff]   ;;  %v4118_v17 = vcombine.high %v5921_v14, %v5921_v14  ;;  %v4910_v34 = vld [vmem:[%s6954_s2 + $0x48c] ss:$16 sps:$4 sm:$0xff]  }
  0x63   : > { %v4887_v21 = vld [vmem:[%s6954_s2 + $0x440] ss:$16 sps:$4 sm:$0xff]  }
  0x64   : > { %1694 = vmatpush1.bf16.msra.mxu0 %v4801_v23  ;;  %v4895_v23 = vld [vmem:[%s6954_s2 + $0x464] ss:$16 sps:$4 sm:$0xff]  }
  0x65   : > { %1852 = vmatpush1.bf16.msra.mxu1 %v4792_v18  ;;  %1695 = vmatprep.subr.bf16.mxu0 %v4809_v25  ;;  %v4886_v18 = vld [vmem:[%s6954_s2 + $0x40c] ss:$16 sps:$4 sm:$0xff]   ;;  %v4893_v25 = vld [vmem:[%s6954_s2 + $0x460] ss:$16 sps:$4 sm:$0xff]  }
  0x66   : > { %1853 = vmatprep.subr.bf16.mxu1 %v4800_v20  ;;  %v4884_v20 = vld [vmem:[%s6954_s2 + $0x408] ss:$16 sps:$4 sm:$0xff]  }
  0x68   : > { %1696 = vmatpush1.bf16.msra.mxu0 %v4807_v27  ;;  %v4901_v27 = vld [vmem:[%s6954_s2 + $0x484] ss:$16 sps:$4 sm:$0xff]  }
  0x69   : > { %1854 = vmatpush1.bf16.msra.mxu1 %v4798_v22  ;;  %1697 = vmatprep.subr.bf16.mxu0 %v4815_v29  ;;  %v4892_v22 = vld [vmem:[%s6954_s2 + $0x42c] ss:$16 sps:$4 sm:$0xff]   ;;  %v4899_v29 = vld [vmem:[%s6954_s2 + $0x480] ss:$16 sps:$4 sm:$0xff]  }
  0x6a   : > { %1855 = vmatprep.subr.bf16.mxu1 %v4806_v24  ;;  %v4890_v24 = vld [vmem:[%s6954_s2 + $0x428] ss:$16 sps:$4 sm:$0xff]  }
  0x6c   : > { %1698 = vmatpush1.bf16.msra.mxu0 %v4813_v32  ;;  %v4907_v32 = vld [vmem:[%s6954_s2 + $0x4a4] ss:$16 sps:$4 sm:$0xff]  }
  0x6d   : > { %1856 = vmatpush1.bf16.msra.mxu1 %v4804_v26  ;;  %1699 = vmatprep.subr.bf16.mxu0 %v4821_v35  ;;  %v4898_v26 = vld [vmem:[%s6954_s2 + $0x44c] ss:$16 sps:$4 sm:$0xff]   ;;  %v4913_v35 = vld [vmem:[%s6954_s2 + $0x4c4] ss:$16 sps:$4 sm:$0xff]  }
  0x6e   : > { %1857 = vmatprep.subr.bf16.mxu1 %v4812_v28  ;;  %v4896_v28 = vld [vmem:[%s6954_s2 + $0x448] ss:$16 sps:$4 sm:$0xff]  }
  0x70   : > { %1700 = vmatpush1.bf16.msra.mxu0 %v4819_v37  ;;  %v4911_v37 = vld [vmem:[%s6954_s2 + $0x4c0] ss:$16 sps:$4 sm:$0xff]  }
  0x71   : > { %1858 = vmatpush1.bf16.msra.mxu1 %v4810_v30  ;;  %1701 = vmatprep.subr.bf16.mxu0 %v4827_v39  ;;  %v4904_v30 = vld [vmem:[%s6954_s2 + $0x46c] ss:$16 sps:$4 sm:$0xff]   ;;  %v4919_v39 = vld [vmem:[%s6954_s2 + $0x4e4] ss:$16 sps:$4 sm:$0xff]  }
  0x72   : > { %1859 = vmatprep.subr.bf16.mxu1 %v4818_v33  ;;  %v4905_v33 = vld [vmem:[%s6954_s2 + $0x4a0] ss:$16 sps:$4 sm:$0xff]  }
  0x74   : > { %1702 = vmatpush1.bf16.msra.mxu0 %v4825_v41  ;;  %v4917_v41 = vld [vmem:[%s6954_s2 + $0x4e0] ss:$16 sps:$4 sm:$0xff]  }
  0x75   : > { %1860 = vmatpush1.bf16.msra.mxu1 %v4816_v36  ;;  %1703 = vmatprep.subr.bf16.mxu0 %v4833_v43  ;;  %v4908_v36 = vld [vmem:[%s6954_s2 + $0x488] ss:$16 sps:$4 sm:$0xff]   ;;  %v4925_v43 = vld [vmem:[%s6954_s2 + $0x504] ss:$16 sps:$4 sm:$0xff]  }
  0x76   : > { %1861 = vmatprep.subr.bf16.mxu1 %v4824_v38  ;;  %v4916_v38 = vld [vmem:[%s6954_s2 + $0x4ac] ss:$16 sps:$4 sm:$0xff]  }
  0x78   : > { %1704 = vmatpush1.bf16.msra.mxu0 %v4831_v45  ;;  %v4923_v45 = vld [vmem:[%s6954_s2 + $0x500] ss:$16 sps:$4 sm:$0xff]  }
  0x79   : > { %1862 = vmatpush1.bf16.msra.mxu1 %v4822_v40  ;;  %1705 = vmatprep.subr.bf16.mxu0 %v4839_v47  ;;  %v4914_v40 = vld [vmem:[%s6954_s2 + $0x4a8] ss:$16 sps:$4 sm:$0xff]   ;;  %v4931_v47 = vld [vmem:[%s6954_s2 + $0x524] ss:$16 sps:$4 sm:$0xff]  }
  0x7a   : > { %1863 = vmatprep.subr.bf16.mxu1 %v4830_v42  ;;  %v4922_v42 = vld [vmem:[%s6954_s2 + $0x4cc] ss:$16 sps:$4 sm:$0xff]  }
  0x7c   : > { %1706 = vmatpush1.bf16.msra.mxu0 %v4837_v49  ;;  %v4929_v49 = vld [vmem:[%s6954_s2 + $0x520] ss:$16 sps:$4 sm:$0xff]  }
  0x7d   : > { %1864 = vmatpush1.bf16.msra.mxu1 %v4828_v44  ;;  %1707 = vmatprep.subr.bf16.mxu0 %v4845_v51  ;;  %v4920_v44 = vld [vmem:[%s6954_s2 + $0x4c8] ss:$16 sps:$4 sm:$0xff]   ;;  %v4937_v51 = vld [vmem:[%s6954_s2 + $0x544] ss:$16 sps:$4 sm:$0xff]  }
  0x7e   : > { %1865 = vmatprep.subr.bf16.mxu1 %v4836_v46  ;;  %v4928_v46 = vld [vmem:[%s6954_s2 + $0x4ec] ss:$16 sps:$4 sm:$0xff]  }
  0x80   : > { %1708 = vmatpush1.bf16.msra.mxu0 %v4843_v53  ;;  %v4935_v53 = vld [vmem:[%s6954_s2 + $0x540] ss:$16 sps:$4 sm:$0xff]  }
  0x81   : > { %1866 = vmatpush1.bf16.msra.mxu1 %v4834_v48  ;;  %1709 = vmatprep.subr.bf16.mxu0 %v4851_v55  ;;  %v4926_v48 = vld [vmem:[%s6954_s2 + $0x4e8] ss:$16 sps:$4 sm:$0xff]   ;;  %v4943_v55 = vld [vmem:[%s6954_s2 + $0x564] ss:$16 sps:$4 sm:$0xff]  }
  0x82   : > { %1867 = vmatprep.subr.bf16.mxu1 %v4842_v50  ;;  %v4934_v50 = vld [vmem:[%s6954_s2 + $0x50c] ss:$16 sps:$4 sm:$0xff]  }
  0x84   : > { %1710 = vmatpush1.bf16.msra.mxu0 %v4849_v57  ;;  %v4941_v57 = vld [vmem:[%s6954_s2 + $0x560] ss:$16 sps:$4 sm:$0xff]  }
  0x85   : > { %1868 = vmatpush1.bf16.msra.mxu1 %v4840_v52  ;;  %1711 = vmatprep.subr.bf16.mxu0 %v4857_v59  ;;  %v4932_v52 = vld [vmem:[%s6954_s2 + $0x508] ss:$16 sps:$4 sm:$0xff]   ;;  %v4949_v59 = vld [vmem:[%s6954_s2 + $0x584] ss:$16 sps:$4 sm:$0xff]  }
  0x86   : > { %1869 = vmatprep.subr.bf16.mxu1 %v4848_v54  ;;  %v4940_v54 = vld [vmem:[%s6954_s2 + $0x52c] ss:$16 sps:$4 sm:$0xff]  }
  0x88   : > { %1712 = vmatpush1.bf16.msra.mxu0 %v4855_v61  ;;  %v4947_v61 = vld [vmem:[%s6954_s2 + $0x580] ss:$16 sps:$4 sm:$0xff]  }
  0x89   : > { %1870 = vmatpush1.bf16.msra.mxu1 %v4846_v56  ;;  %1713 = vmatprep.subr.bf16.mxu0 %v4863_v63  ;;  %v4938_v56 = vld [vmem:[%s6954_s2 + $0x528] ss:$16 sps:$4 sm:$0xff]   ;;  %v4955_v63 = vld [vmem:[%s6954_s2 + $0x5a4] ss:$16 sps:$4 sm:$0xff]  }
  0x8a   : > { %1871 = vmatprep.subr.bf16.mxu1 %v4854_v58  ;;  %v4946_v58 = vld [vmem:[%s6954_s2 + $0x54c] ss:$16 sps:$4 sm:$0xff]  }
  0x8c   : > { %1714 = vmatpush1.bf16.msra.mxu0 %v4861_v1  ;;  %v4953_v1 = vld [vmem:[%s6954_s2 + $0x5a0] ss:$16 sps:$4 sm:$0xff]  }
  0x8d   : > { %1872 = vmatpush1.bf16.msra.mxu1 %v4852_v60  ;;  %1715 = vmatprep.subr.bf16.mxu0 %v4869_v4  ;;  %v4944_v60 = vld [vmem:[%s6954_s2 + $0x548] ss:$16 sps:$4 sm:$0xff]   ;;  %v4961_v4 = vld [vmem:[%s6954_s2 + $0x5c4] ss:$16 sps:$4 sm:$0xff]  }
  0x8e   : > { %1873 = vmatprep.subr.bf16.mxu1 %v4860_v62  ;;  %v4952_v62 = vld [vmem:[%s6954_s2 + $0x56c] ss:$16 sps:$4 sm:$0xff]  }
  0x90   : > { %1716 = vmatpush1.bf16.msra.mxu0 %v4867_v6  ;;  %v4959_v6 = vld [vmem:[%s6954_s2 + $0x5c0] ss:$16 sps:$4 sm:$0xff]  }
  0x91   : > { %1874 = vmatpush1.bf16.msra.mxu1 %v4858_v0  ;;  %1726 = vmatprep.subr.bf16.mxu0 %v4877_v8  ;;  %v4950_v0 = vld [vmem:[%s6954_s2 + $0x568] ss:$16 sps:$4 sm:$0xff]   ;;  %v4967_v8 = vld [vmem:[%s6954_s2 + $0x5e4] ss:$16 sps:$4 sm:$0xff]  }
  0x92   : > { %1875 = vmatprep.subr.bf16.mxu1 %v4866_v3  ;;  %v4958_v3 = vld [vmem:[%s6954_s2 + $0x58c] ss:$16 sps:$4 sm:$0xff]  }
  0x93   : > { %1718 = vmatmul.mubr.bf16.vlgmr.msra.gmra.mrb[0].mxu0 %v4115_v10 }
  0x94   : > { %1727 = vmatpush1.bf16.msra.mxu0 %v4875_v11  ;;  %1758 = vmatprep.mubr.bf16.mxu0 %v4118_v17  ;;  %v4970_v11 = vld [vmem:[%s6954_s2 + $0x5cc] ss:$16 sps:$4 sm:$0xff]  }
  0x95   : > { %1876 = vmatpush1.bf16.msra.mxu1 %v4864_v5  ;;  %1728 = vmatprep.subr.bf16.mxu0 %v4883_v13  ;;  %v4956_v5 = vld [vmem:[%s6954_s2 + $0x588] ss:$16 sps:$4 sm:$0xff]  }
  0x96   : > { %1877 = vmatprep.subr.bf16.mxu1 %v4872_v7  ;;  %v4964_v7 = vld [vmem:[%s6954_s2 + $0x5ac] ss:$16 sps:$4 sm:$0xff]   ;;  %v4968_v13 = vld [vmem:[%s6954_s2 + $0x5c8] ss:$16 sps:$4 sm:$0xff]  }
  0x98   : > { %1729 = vmatpush1.bf16.msra.mxu0 %v4881_v16  ;;  %v4980_v16 = vld [vmem:[%s6956_s4] sm:$0xff]  }
  0x99   : > { %1878 = vmatpush1.bf16.msra.mxu1 %v4870_v9  ;;  %1730 = vmatprep.subr.bf16.mxu0 %v4889_v19  ;;  %v4962_v9 = vld [vmem:[%s6954_s2 + $0x5a8] ss:$16 sps:$4 sm:$0xff]  }
  0x9a   : > { %1879 = vmatprep.subr.bf16.mxu1 %v4880_v12  ;;  %v4979_v12 = vld [vmem:[%s6956_s4 + $0x40] sm:$0xff]   ;;  %v4973_v19 = vld [vmem:[%s6954_s2 + $0x5e8] ss:$16 sps:$4 sm:$0xff]  }
  0x9c   : > { %1731 = vmatpush1.bf16.msra.mxu0 %v4887_v21  ;;  %v4982_v21 = vld [vmem:[%s6956_s4 + $0x8] sm:$0xff]  }
  0x9d   : > { %1880 = vmatpush1.bf16.msra.mxu1 %v4878_v15  ;;  %1732 = vmatprep.subr.bf16.mxu0 %v4895_v23  ;;  %v4975_v15 = vld [vmem:[%s6954_s2 + $0x5ec] ss:$16 sps:$4 sm:$0xff]   ;;  %v4984_v23 = vld [vmem:[%s6956_s4 + $0x10] sm:$0xff]  }
  0x9e   : > { %1890 = vmatprep.subr.bf16.mxu1 %v4886_v18  ;;  %v4981_v18 = vld [vmem:[%s6956_s4 + $0x48] sm:$0xff]  }
  0xa0   : > { %1882 = vmatmul.mubr.bf16.vlgmr.msra.gmra.mrb[4].mxu1 %v4115_v10  ;;  %1733 = vmatpush1.bf16.msra.mxu0 %v4893_v25  ;;  %v4965_v10 = vld [vmem:[%s6954_s2 + $0x5e0] ss:$16 sps:$4 sm:$0xff]   ;;  %v4986_v25 = vld [vmem:[%s6956_s4 + $0x18] sm:$0xff]  }
  0xa1   : > { %1891 = vmatpush1.bf16.msra.mxu1 %v4884_v20  ;;  %1922 = vmatprep.mubr.bf16.mxu1 %v4118_v17  ;;  %v4117_v17 = vcombine.low %v5921_v14, %v5921_v14  ;;  %v4978_v20 = vld [vmem:[%s6954_s2 + $0x60c] ss:$16 sps:$4 sm:$0xff]   ;;  %v4983_v14 = vld [vmem:[%s6956_s4 + $0x50] sm:$0xff]  }
  0xa2   : > { %1892 = vmatprep.subr.bf16.mxu1 %v4892_v22  ;;  %1734 = vmatprep.subr.bf16.mxu0 %v4901_v27  ;;  %v4976_v22 = vld [vmem:[%s6954_s2 + $0x608] ss:$16 sps:$4 sm:$0xff]   ;;  %v4989_v27 = vld [vmem:[%s6956_s4 + $0x20] sm:$0xff]  }
  0xa4   : > { %1735 = vmatpush1.bf16.msra.mxu0 %v4899_v29  ;;  %v4987_v29 = vld [vmem:[%s6956_s4 + $0x80] sm:$0xff]  }
  0xa5   : > { %1893 = vmatpush1.bf16.msra.mxu1 %v4890_v24  ;;  %1736 = vmatprep.subr.bf16.mxu0 %v4907_v32  ;;  %v4985_v24 = vld [vmem:[%s6956_s4 + $0x58] sm:$0xff]  }
  0xa6   : > { %1894 = vmatprep.subr.bf16.mxu1 %v4898_v26  ;;  %v4988_v26 = vld [vmem:[%s6956_s4 + $0x60] sm:$0xff]  }
  0xa8   : > { %1737 = vmatpush1.bf16.msra.mxu0 %v4905_v33 }
  0xa9   : > { %1895 = vmatpush1.bf16.msra.mxu1 %v4896_v28  ;;  %1738 = vmatprep.subr.bf16.mxu0 %v4913_v35  ;;  %v4991_v28 = vld [vmem:[%s6956_s4 + $0x68] sm:$0xff]  }
  0xaa   : > { %1896 = vmatprep.subr.bf16.mxu1 %v4904_v30  ;;  %v4990_v30 = vld [vmem:[%s6956_s4 + $0x88] sm:$0xff]  }
  0xac   : > { %1739 = vmatpush1.bf16.msra.mxu0 %v4911_v37  ;;  %v4993_v37 = vld [vmem:[%s6956_s4 + $0x90] sm:$0xff]  }
  0xad   : > { %1897 = vmatpush1.bf16.msra.mxu1 %v4902_v31  ;;  %1740 = vmatprep.subr.bf16.mxu0 %v4919_v39  ;;  %v5294_v31 = vld [vmem:[%s5536_s25 + $0x18] ss:$0 sps:$4 sm:$0xff]   ;;  %v4995_v39 = vld [vmem:[%s6956_s4 + $0x30] sm:$0xff]   ;;  %s4112_s25 = sshll.u32 %s5518_s24, 3 }
  0xae   : > { %1898 = vmatprep.subr.bf16.mxu1 %v4910_v34 }
  0xb0   : > { %1741 = vmatpush1.bf16.msra.mxu0 %v4917_v41  ;;  %v4997_v41 = vld [vmem:[%s6956_s4 + $0x78] sm:$0xff]  }
  0xb1   : > { %1899 = vmatpush1.bf16.msra.mxu1 %v4908_v36  ;;  %1742 = vmatprep.subr.bf16.mxu0 %v4925_v43  ;;  %v4992_v36 = vld [vmem:[%s6956_s4 + $0x28] sm:$0xff]   ;;  %v4999_v43 = vld [vmem:[%s6956_s4 + $0xa0] sm:$0xff]  }
  0xb2   : > { %1900 = vmatprep.subr.bf16.mxu1 %v4916_v38  ;;  %v4994_v38 = vld [vmem:[%s6956_s4 + $0x70] sm:$0xff]  }
  0xb4   : > { %1743 = vmatpush1.bf16.msra.mxu0 %v4923_v45  ;;  %v5001_v45 = vld [vmem:[%s6956_s4 + $0xb0] sm:$0xff]  }
  0xb5   : > { %1901 = vmatpush1.bf16.msra.mxu1 %v4914_v40  ;;  %1744 = vmatprep.subr.bf16.mxu0 %v4931_v47  ;;  %v4996_v40 = vld [vmem:[%s6956_s4 + $0x98] sm:$0xff]   ;;  %v5003_v47 = vld [vmem:[%s6956_s4 + $0xc0] sm:$0xff]  }
  0xb6   : > { %1902 = vmatprep.subr.bf16.mxu1 %v4922_v42  ;;  %v4998_v42 = vld [vmem:[%s6956_s4 + $0x38] sm:$0xff]  }
  0xb8   : > { %1745 = vmatpush1.bf16.msra.mxu0 %v4929_v49 }
  0xb9   : > { %1903 = vmatpush1.bf16.msra.mxu1 %v4920_v44  ;;  %1746 = vmatprep.subr.bf16.mxu0 %v4937_v51  ;;  %v5000_v44 = vld [vmem:[%s6956_s4 + $0xa8] sm:$0xff]   ;;  %v614_v51 = vld [vmem:[%s6955_s3] sm:$0xf] }
  0xba   : > { %1904 = vmatprep.subr.bf16.mxu1 %v4928_v46  ;;  %v5002_v46 = vld [vmem:[%s6956_s4 + $0xb8] sm:$0xff]  }
  0xbc   : > { %1747 = vmatpush1.bf16.msra.mxu0 %v4935_v53 }
  0xbd   : > { %1905 = vmatpush1.bf16.msra.mxu1 %v4926_v48  ;;  %1748 = vmatprep.subr.bf16.mxu0 %v4943_v55  ;;  %v616_v48 = vlaneseq }
  0xbe   : > { %1906 = vmatprep.subr.bf16.mxu1 %v4934_v50 }
  0xbf   : > { %v6206_v49 = vshrl.u32 %v616_v48, 7  ;;  %v5040_v48 = vld [vmem:[%s6960_s8 + $0xe4] ss:$28 sps:$4 sm:$0xff]  }
  0xc0   : > { %1749 = vmatpush1.bf16.msra.mxu0 %v4941_v57 }
  0xc1   : > { %1907 = vmatpush1.bf16.msra.mxu1 %v4932_v52  ;;  %1750 = vmatprep.subr.bf16.mxu0 %v4949_v59  ;;  %v6209_v50 = vsub.s32 0, %v6206_v49  ;;  %v6215_v52 = vsub.s32 1, %v6206_v49 }
  0xc2   : > { %1908 = vmatprep.subr.bf16.mxu1 %v4940_v54 }
  0xc3   : > { %v619_v53 = vrot.slane %v614_v51, %v6209_v50  ;;  %v623_v54 = vrot.slane %v614_v51, %v6215_v52 }
  0xc4   : > { %1751 = vmatpush1.bf16.msra.mxu0 %v4947_v61 }
  0xc5   : > { %1909 = vmatpush1.bf16.msra.mxu1 %v4938_v56  ;;  %1752 = vmatprep.subr.bf16.mxu0 %v4955_v63 }
  0xc6   : > { %1910 = vmatprep.subr.bf16.mxu1 %v4946_v58 }
  0xc8   : > { %1753 = vmatpush1.bf16.msra.mxu0 %v4953_v1 }
  0xc9   : > { %1911 = vmatpush1.bf16.msra.mxu1 %v4944_v60  ;;  %1754 = vmatprep.subr.bf16.mxu0 %v4961_v4  ;;  %v6220_v4 = vsub.s32 2, %v6206_v49 }
  0xca   : > { %1912 = vmatprep.subr.bf16.mxu1 %v4952_v62 }
  0xcc   : > { %1755 = vmatpush1.bf16.msra.mxu0 %v4959_v6  ;;  %v627_v6 = vrot.slane %v614_v51, %v6220_v4 }
  0xcd   : > { %1913 = vmatpush1.bf16.msra.mxu1 %v4950_v0  ;;  %1756 = vmatprep.subr.bf16.mxu0 %v4967_v8 }
  0xce   : > { %1914 = vmatprep.subr.bf16.mxu1 %v4958_v3 }
  0xd0   : > { %1757 = vmatpush1.bf16.msra.mxu0 %v4965_v10 }
  0xd1   : > { %1915 = vmatpush1.bf16.msra.mxu1 %v4956_v5  ;;  %4541 = vmatprep.subr.bf16.mxu0 %v4979_v12  ;;  %v6223_v5 = vsub.s32 3, %v6206_v49 }
  0xd2   : > { %1916 = vmatprep.subr.bf16.mxu1 %v4964_v7 }
  0xd3   : > { %1759 = vmatmul.mubr.bf16.vlgmr.msra.gmra.mrb[0].mxu0 %v4117_v17  ;;  %v631_v7 = vrot.slane %v614_v51, %v6223_v5  ;;  %v5038_v51 = vld [vmem:[%s6960_s8 + $0xe0] ss:$28 sps:$4 sm:$0xff]  }
  0xd4   : > { %4542 = vmatpush3.bf16.msra.mxu0 %v4980_v16 }
  0xd5   : > { %1917 = vmatpush1.bf16.msra.mxu1 %v4962_v9  ;;  %4543 = vmatprep.subr.bf16.mxu0 %v4981_v18 }
  0xd6   : > { %1918 = vmatprep.subr.bf16.mxu1 %v4970_v11 }
  0xd8   : > { %4544 = vmatpush3.bf16.msra.mxu0 %v4982_v21 }
  0xd9   : > { %1919 = vmatpush1.bf16.msra.mxu1 %v4968_v13  ;;  %4545 = vmatprep.subr.bf16.mxu0 %v4983_v14 }
  0xda   : > { %1920 = vmatprep.subr.bf16.mxu1 %v4975_v15 }
  0xdc   : > { %4546 = vmatpush3.bf16.msra.mxu0 %v4984_v23 }
  0xdd   : > { %1921 = vmatpush1.bf16.msra.mxu1 %v4973_v19  ;;  %4547 = vmatprep.subr.bf16.mxu0 %v4985_v24  ;;  %v5004_v19 = vld [vmem:[%s6958_s6] ss:$16 sps:$4 sm:$0xff]  }
  0xde   : > { %1931 = vmatprep.subr.bf16.mxu1 %v4978_v20  ;;  %v5006_v20 = vld [vmem:[%s6958_s6 + $0x4] ss:$16 sps:$4 sm:$0xff]  }
  0xe0   : > { %1923 = vmatmul.mubr.bf16.vlgmr.msra.gmra.mrb[4].mxu1 %v4117_v17  ;;  %4548 = vmatpush3.bf16.msra.mxu0 %v4986_v25  ;;  %v4318_v25 = vld [vmem:[%s6957_s5] ss:$0 sm:$0xff] }
  0xe1   : > { %1932 = vmatpush1.bf16.msra.mxu1 %v4976_v22  ;;  %1963 = vmatprep.mubr.bf16.mxu1 %v5391_v2 }
  0xe2   : > { %2230 = vmatprep.subr.bf16.mxu1 %v5391_v2  ;;  %4549 = vmatprep.subr.bf16.mxu0 %v4988_v26 }
  0xe4   : > { %4550 = vmatpush3.bf16.msra.mxu0 %v4989_v27 }
  0xe5   : > { %4551 = vmatprep.subr.bf16.mxu0 %v4991_v28 }
  0xe8   : > { %4552 = vmatpush3.bf16.msra.mxu0 %v4992_v36 }
  0xe9   : > { %4553 = vmatprep.subr.bf16.mxu0 %v4994_v38  ;;  %v5011_v38 = vld [vmem:[%s6958_s6 + $0xc] ss:$16 sps:$4 sm:$0xff]  }
  0xec   : > { %4317 = vmatmul.mubr.msk.bf16.vlgmr.msra.gmra.mrb[4].mxu1 %vm1640_vm0, %v5294_v31  ;;  %4554 = vmatpush3.bf16.msra.mxu0 %v4995_v39 }
  0xed   : > { %2231 = vmatpush1.bf16.msra.mxu1 %v4987_v29  ;;  %4555 = vmatprep.subr.bf16.mxu0 %v4997_v41  ;;  %v5016_v41 = vld [vmem:[%s6960_s8 + $0x4] ss:$28 sps:$4 sm:$0xff]  }
  0xee   : > { %2232 = vmatprep.subr.bf16.mxu1 %v5391_v2 }
  0xf0   : > { %4556 = vmatpush3.bf16.msra.mxu0 %v4998_v42  ;;  %v5022_v42 = vld [vmem:[%s6960_s8 + $0x3c] ss:$28 sps:$4 sm:$0xff]  }
  0xf1   : > { %2233 = vmatpush1.bf16.msra.mxu1 %v4990_v30  ;;  %3586 = vmatprep.subr.bf16.mxu0 %v5016_v41  ;;  %v5077_v41 = vld [vmem:[%s6960_s8 + $0x238] ss:$28 sps:$4 sm:$0xff]  }
  0xf2   : > { %2234 = vmatprep.subr.bf16.mxu1 %v5391_v2 }
  0xf3   : > { %v1801_v32 = vpop.f32.mrb[0].mxu1 }
  0xf4   : > { %v1803_v33 = vpop.f32.mrb[1].mxu1 }
  0xf5   : > { %v1805_v34 = vpop.f32.mrb[2].mxu1  ;;  %2235 = vmatpush1.bf16.msra.mxu1 %v4993_v37 }
  0xf6   : > { %v1806_v35 = vpop.f32.mrb[3].mxu1  ;;  %2236 = vmatprep.subr.bf16.mxu1 %v5391_v2 }
  0xf9   : > { %2237 = vmatpush1.bf16.msra.mxu1 %v4996_v40  ;;  %v5014_v40 = vld [vmem:[%s6960_s8] ss:$28 sps:$4 sm:$0xff]  }
  0xfa   : > { %2238 = vmatprep.subr.bf16.mxu1 %v5391_v2 }
  0xfd   : > { %2239 = vmatpush1.bf16.msra.mxu1 %v4999_v43  ;;  %v5020_v43 = vld [vmem:[%s6960_s8 + $0x38] ss:$28 sps:$4 sm:$0xff]  }
  0xfe   : > { %2240 = vmatprep.subr.bf16.mxu1 %v5391_v2 }
 0x101   : > { %2241 = vmatpush1.bf16.msra.mxu1 %v5000_v44  ;;  %v5028_v44 = vld [vmem:[%s6960_s8 + $0x74] ss:$28 sps:$4 sm:$0xff]  }
 0x102   : > { %2242 = vmatprep.subr.bf16.mxu1 %v5391_v2 }
 0x105   : > { %2243 = vmatpush1.bf16.msra.mxu1 %v5001_v45  ;;  %v5026_v45 = vld [vmem:[%s6960_s8 + $0x70] ss:$28 sps:$4 sm:$0xff]  }
 0x106   : > { %2244 = vmatprep.subr.bf16.mxu1 %v5391_v2 }
 0x109   : > { %2245 = vmatpush1.bf16.msra.mxu1 %v5002_v46  ;;  %v5034_v46 = vld [vmem:[%s6960_s8 + $0xac] ss:$28 sps:$4 sm:$0xff]  }
 0x10a   : > { %2246 = vmatprep.subr.bf16.mxu1 %v5391_v2 }
 0x10d   : > { %2247 = vmatpush1.bf16.msra.mxu1 %v5003_v47  ;;  %v5032_v47 = vld [vmem:[%s6960_s8 + $0xa8] ss:$28 sps:$4 sm:$0xff]  }
 0x10e   : > { %2356 = vmatprep.subr.bf16.mxu1 %v5006_v20 }
 0x1a6   : > { %v1760_v55 = vpop.f32.mrb[0].mxu0 }
 0x1a7   : > { %v4585_v56 = vadd.f32 %v1760_v55, %v619_v53  ;;  %v1762_v57 = vpop.f32.mrb[1].mxu0  ;;  %v5046_v53 = vld [vmem:[%s6960_s8 + $0x11c] ss:$28 sps:$4 sm:$0xff]   ;;  %v5052_v55 = vld [vmem:[%s6960_s8 + $0x154] ss:$28 sps:$4 sm:$0xff]  }
 0x1a8   : > { %v4587_v58 = vadd.f32 %v1762_v57, %v623_v54  ;;  %v1764_v59 = vpop.f32.mrb[2].mxu0  ;;  %v5044_v54 = vld [vmem:[%s6960_s8 + $0x118] ss:$28 sps:$4 sm:$0xff]   ;;  %v5058_v57 = vld [vmem:[%s6960_s8 + $0x18c] ss:$28 sps:$4 sm:$0xff]  }
 0x1a9   : > { %v4586_v60 = vadd.f32 %v4585_v56, %v1801_v32  ;;  %v1765_v61 = vpop.f32.mrb[3].mxu0  ;;  %v5050_v56 = vld [vmem:[%s6960_s8 + $0x150] ss:$28 sps:$4 sm:$0xff]   ;;  %v5064_v59 = vld [vmem:[%s6960_s8 + $0x1c4] ss:$28 sps:$4 sm:$0xff]  }
 0x1aa   : > { %v4588_v62 = vadd.f32 %v4587_v58, %v1803_v33  ;;  %v2285_v33 = vld [vmem:[%s6958_s6 + $0x20] sm:$0x33]  ;;  %v5070_v61 = vld [vmem:[%s6960_s8 + $0x1fc] ss:$28 sps:$4 sm:$0xff]  }
 0x1ab   : > { %v1972_v63 = vmax.f32 %v4586_v60, 0.0  ;;  %v4350_v35 = vcombine.high %v2285_v33, %v2285_v33  ;;  %v4349_v36 = vcombine.low %v2285_v33, %v2285_v33  ;;  %v5056_v58 = vld [vmem:[%s6960_s8 + $0x188] ss:$28 sps:$4 sm:$0xff]   ;;  %v5062_v60 = vld [vmem:[%s6960_s8 + $0x1c0] ss:$28 sps:$4 sm:$0xff]  }
 0x1ac   : > { %v1973_v0 = vmax.f32 %v4588_v62, 0.0  ;;  %v5068_v62 = vld [vmem:[%s6960_s8 + $0x1f8] ss:$28 sps:$4 sm:$0xff]  }
 0x1ad   : > { %v1976_v3 = vpack.c.bf16 %v1972_v63, %v1972_v63  ;;  %v2345_v37 = vsel %vm2343_vm2, %v4349_v36, 0  ;;  %v5076_v63 = vld [vmem:[%s6960_s8 + $0x234] ss:$28 sps:$4 sm:$0xff]   ;;  %v5067_v36 = vld [vmem:[%s6960_s8 + $0x1cc] ss:$28 sps:$4 sm:$0xff]  }
 0x1ae   : > { %v1977_v1 = vpack.c.bf16 %v1973_v0, %v1973_v0  ;;  %v5074_v0 = vld [vmem:[%s6960_s8 + $0x230] ss:$28 sps:$4 sm:$0xff]   ;;  %v5053_v33 = vld [vmem:[%s6960_s8 + $0x158] ss:$28 sps:$4 sm:$0xff]  }
 0x1b0   : > { %2222 = vmatprep.mubr.bf16.mxu0 %v1977_v1  ;;  %v5082_v1 = vld [vmem:[%s6960_s8 + $0x26c] ss:$28 sps:$4 sm:$0xff]  }
 0x1b1   : > { %2223 = vmatmul.mubr.bf16.vlgmr.msra.gmra.mrb[4].mxu0 %v1976_v3  ;;  %v5080_v3 = vld [vmem:[%s6960_s8 + $0x268] ss:$28 sps:$4 sm:$0xff]  }
 0x1b2   : > { %3587 = vmatpush1.bf16.msra.mxu0 %v5014_v40  ;;  %v5079_v40 = vld [vmem:[%s6960_s8 + $0x23c] ss:$28 sps:$4 sm:$0xff]  }
 0x1b3   : > { %3588 = vmatprep.subr.bf16.mxu0 %v5022_v42  ;;  %v5085_v42 = vld [vmem:[%s6960_s8 + $0x274] ss:$28 sps:$4 sm:$0xff]  }
 0x1b6   : > { %3589 = vmatpush1.bf16.msra.mxu0 %v5020_v43  ;;  %v5083_v43 = vld [vmem:[%s6960_s8 + $0x270] ss:$28 sps:$4 sm:$0xff]  }
 0x1b7   : > { %3590 = vmatprep.subr.bf16.mxu0 %v5028_v44  ;;  %v5091_v44 = vld [vmem:[%s6960_s8 + $0x2ac] ss:$28 sps:$4 sm:$0xff]  }
 0x1ba   : > { %3591 = vmatpush1.bf16.msra.mxu0 %v5026_v45  ;;  %v5089_v45 = vld [vmem:[%s6960_s8 + $0x2a8] ss:$28 sps:$4 sm:$0xff]  }
 0x1bb   : > { %3592 = vmatprep.subr.bf16.mxu0 %v5034_v46  ;;  %v5097_v46 = vld [vmem:[%s6960_s8 + $0x2e4] ss:$28 sps:$4 sm:$0xff]  }
 0x1be   : > { %3593 = vmatpush1.bf16.msra.mxu0 %v5032_v47  ;;  %v5095_v47 = vld [vmem:[%s6960_s8 + $0x2e0] ss:$28 sps:$4 sm:$0xff]  }
 0x1bf   : > { %v1965_v8 = vpop.f32.mrb[4].mxu1  ;;  %3594 = vmatprep.subr.bf16.mxu0 %v5040_v48  ;;  %v5100_v48 = vld [vmem:[%s6960_s8 + $0x314] ss:$28 sps:$4 sm:$0xff]  }
 0x1c0   : > { %v4589_v9 = vadd.f32 %v1965_v8, %v627_v6  ;;  %v1967_v10 = vpop.f32.mrb[5].mxu1  ;;  %v5088_v6 = vld [vmem:[%s6960_s8 + $0x2a4] ss:$28 sps:$4 sm:$0xff]   ;;  %v5094_v8 = vld [vmem:[%s6960_s8 + $0x2dc] ss:$28 sps:$4 sm:$0xff]  }
 0x1c1   : > { %v4590_v11 = vadd.f32 %v1967_v10, %v631_v7  ;;  %v1969_v12 = vpop.f32.mrb[6].mxu1  ;;  %v5086_v7 = vld [vmem:[%s6960_s8 + $0x2a0] ss:$28 sps:$4 sm:$0xff]  }
 0x1c2   : > { %v1974_v13 = vmax.f32 %v4589_v9, 0.0  ;;  %v1970_v15 = vpop.f32.mrb[7].mxu1  ;;  %3595 = vmatpush1.bf16.msra.mxu0 %v5038_v51  ;;  %v5092_v9 = vld [vmem:[%s6960_s8 + $0x2d8] ss:$28 sps:$4 sm:$0xff]  }
 0x1c3   : > { %v1975_v16 = vmax.f32 %v4590_v11, 0.0  ;;  %3596 = vmatprep.subr.bf16.mxu0 %v5046_v53  ;;  %v5103_v51 = vld [vmem:[%s6960_s8 + $0x31c] ss:$28 sps:$4 sm:$0xff]   ;;  %v5098_v53 = vld [vmem:[%s6960_s8 + $0x310] ss:$28 sps:$4 sm:$0xff]  }
 0x1c4   : > { %v1978_v18 = vpack.c.bf16 %v1974_v13, %v1974_v13  ;;  %v2286_v13 = vld [vmem:[%s6958_s6 + $0x28] sm:$0x33] }
 0x1c5   : > { %v1979_v17 = vpack.c.bf16 %v1975_v16, %v1975_v16  ;;  %v5009_v16 = vld [vmem:[%s6958_s6 + $0x8] ss:$16 sps:$4 sm:$0xff]  }
 0x1c6   : > { %3597 = vmatpush1.bf16.msra.mxu0 %v5044_v54  ;;  %v5101_v54 = vld [vmem:[%s6960_s8 + $0x318] ss:$28 sps:$4 sm:$0xff]  }
 0x1c7   : > { %4344 = vmatprep.mubr.msk.bf16.mxu1 %vm1640_vm0, %v1979_v17  ;;  %3598 = vmatprep.subr.bf16.mxu0 %v5052_v55  ;;  %v5106_v55 = vld [vmem:[%s6960_s8 + $0x34c] ss:$28 sps:$4 sm:$0xff]  }
 0x1c8   : > { %2263 = vmatmul.mubr.bf16.vlgmr.msra.gmra.mrb[8].mxu1 %v1978_v18  ;;  %v4352_v18 = vcombine.high %v2286_v13, %v2286_v13 }
 0x1c9   : > { %2388 = vmatprep.mubr.bf16.mxu1 %v5391_v2  ;;  %2357 = vmatpush1.bf16.msra.mxu1 %v5004_v19  ;;  %v4351_v19 = vcombine.low %v2286_v13, %v2286_v13  ;;  %v5113_v13 = vld [vmem:[%s6960_s8 + $0x388] ss:$28 sps:$4 sm:$0xff]  }
 0x1ca   : > { %4353 = vmatprep.subr.msk.bf16.mxu1 %vm2343_vm2, %v4350_v35  ;;  %3599 = vmatpush1.bf16.msra.mxu0 %v5050_v56  ;;  %v5059_v35 = vld [vmem:[%s6960_s8 + $0x190] ss:$28 sps:$4 sm:$0xff]  }
 0x1cb   : > { %3600 = vmatprep.subr.bf16.mxu0 %v5058_v57  ;;  %v2351_v20 = vsel %vm2343_vm2, %v4351_v19, 0  ;;  %v5109_v56 = vld [vmem:[%s6960_s8 + $0x354] ss:$28 sps:$4 sm:$0xff]   ;;  %v5104_v57 = vld [vmem:[%s6960_s8 + $0x348] ss:$28 sps:$4 sm:$0xff]  }
 0x1cd   : > { %2359 = vmatpush1.bf16.msra.mxu1 %v2345_v37  ;;  %v5065_v37 = vld [vmem:[%s6960_s8 + $0x1c8] ss:$28 sps:$4 sm:$0xff]  }
 0x1ce   : > { %2397 = vmatprep.subr.bf16.mxu1 %v5011_v38  ;;  %3601 = vmatpush1.bf16.msra.mxu0 %v5056_v58  ;;  %v5073_v38 = vld [vmem:[%s6960_s8 + $0x204] ss:$28 sps:$4 sm:$0xff]   ;;  %v5107_v58 = vld [vmem:[%s6960_s8 + $0x350] ss:$28 sps:$4 sm:$0xff]  }
 0x1cf   : > { %3602 = vmatprep.subr.bf16.mxu0 %v5064_v59  ;;  %v5112_v59 = vld [vmem:[%s6960_s8 + $0x384] ss:$28 sps:$4 sm:$0xff]  }
 0x1d2   : > { %3603 = vmatpush1.bf16.msra.mxu0 %v5062_v60  ;;  %v5115_v60 = vld [vmem:[%s6960_s8 + $0x38c] ss:$28 sps:$4 sm:$0xff]  }
 0x1d3   : > { %3604 = vmatprep.subr.bf16.mxu0 %v5070_v61  ;;  %v6472_v61 = vld [vmem:[%s6959_s7] sm:$0xf] }
 0x1d6   : > { %3605 = vmatpush1.bf16.msra.mxu0 %v5068_v62  ;;  %v2292_v62 = vrot.slane %v6472_v61, %v6209_v50 }
 0x1d7   : > { %3606 = vmatprep.subr.bf16.mxu0 %v5076_v63  ;;  %v2296_v63 = vrot.slane %v6472_v61, %v6215_v52 }
 0x1da   : > { %3607 = vmatpush1.bf16.msra.mxu0 %v5074_v0 }
 0x1db   : > { %3608 = vmatprep.subr.bf16.mxu0 %v5082_v1 }
 0x1de   : > { %3609 = vmatpush1.bf16.msra.mxu0 %v5080_v3 }
 0x1df   : > { %3610 = vmatprep.subr.bf16.mxu0 %v5088_v6 }
 0x1e2   : > { %3611 = vmatpush1.bf16.msra.mxu0 %v5086_v7 }
 0x1e3   : > { %3612 = vmatprep.subr.bf16.mxu0 %v5094_v8 }
 0x1e6   : > { %3613 = vmatpush1.bf16.msra.mxu0 %v5092_v9 }
 0x1e7   : > { %3614 = vmatprep.subr.bf16.mxu0 %v5100_v48  ;;  %v5154_v48 = vld [vmem:[%s6960_s8 + $0x50c] ss:$28 sps:$4 sm:$0xff]  }
 0x1ea   : > { %3615 = vmatpush1.bf16.msra.mxu0 %v5098_v53  ;;  %v5152_v53 = vld [vmem:[%s6960_s8 + $0x508] ss:$28 sps:$4 sm:$0xff]  }
 0x1eb   : > { %3616 = vmatprep.subr.bf16.mxu0 %v5106_v55 }
 0x1ee   : > { %3617 = vmatpush1.bf16.msra.mxu0 %v5104_v57  ;;  %v5163_v57 = vld [vmem:[%s6960_s8 + $0x54c] ss:$28 sps:$4 sm:$0xff]  }
 0x1ef   : > { %3627 = vmatprep.subr.bf16.mxu0 %v5112_v59  ;;  %v5161_v59 = vld [vmem:[%s6960_s8 + $0x548] ss:$28 sps:$4 sm:$0xff]  }
 0x284   : > { %v4557_v21 = vpop.f32.mrb[4].mxu0 }
 0x285   : > { %v4558_v14 = vpop.f32.mrb[5].mxu0 }
 0x286   : > { %v4559_v22 = vadd.f32 %v4558_v14, %v4557_v21  ;;  %v4560_v23 = vpop.f32.mrb[6].mxu0  ;;  %v5019_v21 = vld [vmem:[%s6960_s8 + $0xc] ss:$28 sps:$4 sm:$0xff]  }
 0x287   : > { %v4561_v24 = vpop.f32.mrb[7].mxu0  ;;  %v5017_v14 = vld [vmem:[%s6960_s8 + $0x8] ss:$28 sps:$4 sm:$0xff]   ;;  %v5023_v23 = vld [vmem:[%s6960_s8 + $0x40] ss:$28 sps:$4 sm:$0xff]  }
 0x288   : > { %v2225_v26 = vadd.f32 %v4559_v22, %v4318_v25  ;;  %v5025_v22 = vld [vmem:[%s6960_s8 + $0x44] ss:$28 sps:$4 sm:$0xff]   ;;  %v5031_v24 = vld [vmem:[%s6960_s8 + $0x7c] ss:$28 sps:$4 sm:$0xff]  }
 0x289   : > { %v5029_v25 = vld [vmem:[%s6960_s8 + $0x78] ss:$28 sps:$4 sm:$0xff]  }
 0x29b   : > { %v2264_v27 = vpop.f32.mrb[8].mxu1 }
 0x29c   : > { %v6242_v28 = vadd.f32 %v2264_v27, %v2225_v26  ;;  %v2266_v29 = vpop.f32.mrb[9].mxu1  ;;  %v5037_v26 = vld [vmem:[%s6960_s8 + $0xb4] ss:$28 sps:$4 sm:$0xff]  }
 0x29d   : > { %v2267_v30 = vpop.f32.mrb[10].mxu1  ;;  %v5035_v27 = vld [vmem:[%s6960_s8 + $0xb0] ss:$28 sps:$4 sm:$0xff]   ;;  %v5041_v29 = vld [vmem:[%s6960_s8 + $0xe8] ss:$28 sps:$4 sm:$0xff]  }
 0x29e   : > { %v2271_v31 = vmul.f32 0.5, %v6242_v28  ;;  %v2268_v32 = vpop.f32.mrb[11].mxu1  ;;  %3969 = vst.msk [vmem:[%s6245_s13] sm:$0xff] %vm3968_vm1, %v6242_v28  ;;  %v5049_v30 = vld [vmem:[%s6960_s8 + $0x124] ss:$28 sps:$4 sm:$0xff]  }
 0x29f   : > { %v5055_v32 = vld [vmem:[%s6960_s8 + $0x15c] ss:$28 sps:$4 sm:$0xff]  }
 0x2a0   : > { %v2272_v34 = vmul.f32 1.442695, %v2271_v31  ;;  %v5047_v31 = vld [vmem:[%s6960_s8 + $0x120] ss:$28 sps:$4 sm:$0xff]  }
 0x2a2   : > { %5264 = vpow2.f32 %v2272_v34  ;;  %v5061_v34 = vld [vmem:[%s6960_s8 + $0x194] ss:$28 sps:$4 sm:$0xff]  }
 0x2ac   : > { %v5265_v39 = vpop.eup %5264 }
 0x2ad   : > { %2275 = vrot.lane.b32.xlu0 %v5265_v39, %s5392_s26  ;;  %s412_s26 = scalar_lea.vmem %s6953_s1, %s4112_s25  ;;  %v5071_v39 = vld [vmem:[%s6960_s8 + $0x200] ss:$28 sps:$4 sm:$0xff]  }
 0x2ae   : > { %v2270_v10 = vld [vmem:[%s412_s26] sm:$0xff]  ;;  %s3976_s26 = scalar_lea.sflag [#allocation5], %s6236_s22 }
 0x31f   : > { %v2276_v11 = vpop.permute.xlu0 %2275 }
 0x320   : > { %v2278_v12 = vmul.f32 %v2276_v11, %v2270_v10 }
 0x322   : > { %v2279_v15 = vadd.f32 %v2278_v12, %v6242_v28  ;;  %v5043_v28 = vld [vmem:[%s6960_s8 + $0xec] ss:$28 sps:$4 sm:$0xff]   ;;  %v5110_v12 = vld [vmem:[%s6960_s8 + $0x380] ss:$28 sps:$4 sm:$0xff]  }
 0x324   : > { %v2280_v17 = vpack.c.bf16 %v2279_v15, %v2279_v15  ;;  %v2304_v15 = vrot.slane %v6472_v61, %v6223_v5 }
 0x326   : > { %4354 = vmatmul.mubr.msk.bf16.vlgmr.msra.gmra.mrb[12].mxu1 %vm2339_vm3, %v2280_v17 }
 0x327   : > { %2398 = vmatpush1.bf16.msra.mxu1 %v5009_v16  ;;  %2429 = vmatprep.mubr.bf16.mxu1 %v5391_v2 }
 0x328   : > { %4355 = vmatprep.subr.msk.bf16.mxu1 %vm2343_vm2, %v4352_v18  ;;  %v5121_v18 = vld [vmem:[%s6960_s8 + $0x3c4] ss:$28 sps:$4 sm:$0xff]  }
 0x32b   : > { %2400 = vmatpush1.bf16.msra.mxu1 %v2351_v20 }
 0x32c   : > { %3668 = vmatprep.subr.bf16.mxu1 %v5019_v21 }
 0x32e   : > { %4356 = vmatmul.mubr.msk.bf16.vlgmr.msra.gmra.mrb[16].mxu1 %vm2339_vm3, %v2280_v17  ;;  %v5118_v17 = vld [vmem:[%s6960_s8 + $0x3bc] ss:$28 sps:$4 sm:$0xff]  }
 0x32f   : > { %3669 = vmatpush1.bf16.msra.mxu1 %v5017_v14 }
 0x330   : > { %3670 = vmatprep.subr.bf16.mxu1 %v5025_v22  ;;  %v5116_v22 = vld [vmem:[%s6960_s8 + $0x3b8] ss:$28 sps:$4 sm:$0xff]  }
 0x333   : > { %3671 = vmatpush1.bf16.msra.mxu1 %v5023_v23  ;;  %v5119_v23 = vld [vmem:[%s6960_s8 + $0x3c0] ss:$28 sps:$4 sm:$0xff]  }
 0x334   : > { %3672 = vmatprep.subr.bf16.mxu1 %v5031_v24 }
 0x337   : > { %3673 = vmatpush1.bf16.msra.mxu1 %v5029_v25  ;;  %v5124_v25 = vld [vmem:[%s6960_s8 + $0x3f4] ss:$28 sps:$4 sm:$0xff]  }
 0x338   : > { %3674 = vmatprep.subr.bf16.mxu1 %v5037_v26  ;;  %v5127_v26 = vld [vmem:[%s6960_s8 + $0x3fc] ss:$28 sps:$4 sm:$0xff]  }
 0x33b   : > { %3675 = vmatpush1.bf16.msra.mxu1 %v5035_v27 }
 0x33c   : > { %3676 = vmatprep.subr.bf16.mxu1 %v5043_v28 }
 0x33f   : > { %3677 = vmatpush1.bf16.msra.mxu1 %v5041_v29  ;;  %v5122_v29 = vld [vmem:[%s6960_s8 + $0x3f0] ss:$28 sps:$4 sm:$0xff]  }
 0x340   : > { %3678 = vmatprep.subr.bf16.mxu1 %v5049_v30  ;;  %v5125_v30 = vld [vmem:[%s6960_s8 + $0x3f8] ss:$28 sps:$4 sm:$0xff]  }
 0x343   : > { %3679 = vmatpush1.bf16.msra.mxu1 %v5047_v31  ;;  %v5130_v31 = vld [vmem:[%s6960_s8 + $0x42c] ss:$28 sps:$4 sm:$0xff]  }
 0x344   : > { %3680 = vmatprep.subr.bf16.mxu1 %v5055_v32  ;;  %v5133_v32 = vld [vmem:[%s6960_s8 + $0x434] ss:$28 sps:$4 sm:$0xff]  }
 0x347   : > { %3681 = vmatpush1.bf16.msra.mxu1 %v5053_v33  ;;  %v5128_v33 = vld [vmem:[%s6960_s8 + $0x428] ss:$28 sps:$4 sm:$0xff]  }
 0x348   : > { %3682 = vmatprep.subr.bf16.mxu1 %v5061_v34  ;;  %v5131_v34 = vld [vmem:[%s6960_s8 + $0x430] ss:$28 sps:$4 sm:$0xff]  }
 0x34b   : > { %3683 = vmatpush1.bf16.msra.mxu1 %v5059_v35  ;;  %v5136_v35 = vld [vmem:[%s6960_s8 + $0x464] ss:$28 sps:$4 sm:$0xff]  }
 0x34c   : > { %3684 = vmatprep.subr.bf16.mxu1 %v5067_v36  ;;  %v5139_v36 = vld [vmem:[%s6960_s8 + $0x46c] ss:$28 sps:$4 sm:$0xff]  }
 0x34f   : > { %3685 = vmatpush1.bf16.msra.mxu1 %v5065_v37  ;;  %v5134_v37 = vld [vmem:[%s6960_s8 + $0x460] ss:$28 sps:$4 sm:$0xff]  }
 0x350   : > { %3686 = vmatprep.subr.bf16.mxu1 %v5073_v38  ;;  %v5137_v38 = vld [vmem:[%s6960_s8 + $0x468] ss:$28 sps:$4 sm:$0xff]  }
 0x353   : > { %3687 = vmatpush1.bf16.msra.mxu1 %v5071_v39  ;;  %v5142_v39 = vld [vmem:[%s6960_s8 + $0x49c] ss:$28 sps:$4 sm:$0xff]  }
 0x354   : > { %3688 = vmatprep.subr.bf16.mxu1 %v5079_v40  ;;  %v5145_v40 = vld [vmem:[%s6960_s8 + $0x4a4] ss:$28 sps:$4 sm:$0xff]  }
 0x357   : > { %3689 = vmatpush1.bf16.msra.mxu1 %v5077_v41  ;;  %v5140_v41 = vld [vmem:[%s6960_s8 + $0x498] ss:$28 sps:$4 sm:$0xff]  }
 0x358   : > { %3690 = vmatprep.subr.bf16.mxu1 %v5085_v42  ;;  %v5143_v42 = vld [vmem:[%s6960_s8 + $0x4a0] ss:$28 sps:$4 sm:$0xff]  }
 0x35b   : > { %3691 = vmatpush1.bf16.msra.mxu1 %v5083_v43  ;;  %v5148_v43 = vld [vmem:[%s6960_s8 + $0x4d4] ss:$28 sps:$4 sm:$0xff]  }
 0x35c   : > { %3692 = vmatprep.subr.bf16.mxu1 %v5091_v44  ;;  %v5151_v44 = vld [vmem:[%s6960_s8 + $0x4dc] ss:$28 sps:$4 sm:$0xff]  }
 0x35f   : > { %3693 = vmatpush1.bf16.msra.mxu1 %v5089_v45  ;;  %v5146_v45 = vld [vmem:[%s6960_s8 + $0x4d0] ss:$28 sps:$4 sm:$0xff]  }
 0x360   : > { %3694 = vmatprep.subr.bf16.mxu1 %v5097_v46  ;;  %v5149_v46 = vld [vmem:[%s6960_s8 + $0x4d8] ss:$28 sps:$4 sm:$0xff]  }
 0x363   : > { %3695 = vmatpush1.bf16.msra.mxu1 %v5095_v47  ;;  %v2300_v47 = vrot.slane %v6472_v61, %v6220_v4  ;;  %v5166_v61 = vld [vmem:[%s6960_s8 + $0x14] ss:$28 sps:$4 sm:$0xff]  }
 0x364   : > { %3696 = vmatprep.subr.bf16.mxu1 %v5103_v51  ;;  %v5157_v51 = vld [vmem:[%s6960_s8 + $0x514] ss:$28 sps:$4 sm:$0xff]  }
 0x367   : > { %3697 = vmatpush1.bf16.msra.mxu1 %v5101_v54  ;;  %v5155_v54 = vld [vmem:[%s6960_s8 + $0x510] ss:$28 sps:$4 sm:$0xff]  }
 0x368   : > { %3698 = vmatprep.subr.bf16.mxu1 %v5109_v56  ;;  %v5160_v56 = vld [vmem:[%s6960_s8 + $0x544] ss:$28 sps:$4 sm:$0xff]  }
 0x36b   : > { %3699 = vmatpush1.bf16.msra.mxu1 %v5107_v58  ;;  %v5158_v58 = vld [vmem:[%s6960_s8 + $0x540] ss:$28 sps:$4 sm:$0xff]  }
 0x36c   : > { %3709 = vmatprep.subr.bf16.mxu1 %v5115_v60 }
 0x3f9   : > { %v2390_v0 = vpop.f32.mrb[12].mxu1 }
 0x3fa   : > { %v2391_v1 = vadd.f32 %v2390_v0, %v2292_v62  ;;  %v2392_v3 = vpop.f32.mrb[13].mxu1  ;;  %v5167_v62 = vld [vmem:[%s6960_s8 + $0x1d8] ss:$28 sps:$4 sm:$0xff]  }
 0x3fb   : > { %v2393_v6 = vadd.f32 %v2392_v3, %v2296_v63  ;;  %v2394_v7 = vpop.f32.mrb[14].mxu1  ;;  %v5164_v63 = vld [vmem:[%s6960_s8 + $0x10] ss:$28 sps:$4 sm:$0xff]  }
 0x3fc   : > { %v2438_v8 = vmax.f32 %v2391_v1, 0.0  ;;  %v2395_v9 = vpop.f32.mrb[15].mxu1  ;;  %v5168_v1 = vld [vmem:[%s6960_s8 + $0x18] ss:$28 sps:$4 sm:$0xff]   ;;  %v5171_v3 = vld [vmem:[%s6960_s8 + $0x4c] ss:$28 sps:$4 sm:$0xff]  }
 0x3fd   : > { %v2439_v10 = vmax.f32 %v2393_v6, 0.0  ;;  %v5172_v6 = vld [vmem:[%s6960_s8 + $0x210] ss:$28 sps:$4 sm:$0xff]   ;;  %v5169_v7 = vld [vmem:[%s6960_s8 + $0x48] ss:$28 sps:$4 sm:$0xff]  }
 0x3fe   : > { %v6488_v16 = vpack.c.bf16 %v2438_v8, %v2438_v8  ;;  %v5173_v8 = vld [vmem:[%s6960_s8 + $0x50] ss:$28 sps:$4 sm:$0xff]   ;;  %v5176_v9 = vld [vmem:[%s6960_s8 + $0x84] ss:$28 sps:$4 sm:$0xff]  }
 0x3ff   : > { %v6478_v11 = vpack.c.bf16 %v2439_v10, %v2439_v10  ;;  %v5177_v10 = vld [vmem:[%s6960_s8 + $0x248] ss:$28 sps:$4 sm:$0xff]  }
 0x401   : > { %v6496_v19 = vpop.f32.mrb[16].mxu1  ;;  %3618 = vmatprep.mubr.bf16.mxu0 %v6478_v11  ;;  %3700 = vmatprep.mubr.bf16.mxu1 %v6478_v11 }
 0x402   : > { %v2433_v20 = vpop.f32.mrb[17].mxu1  ;;  %3619 = vmatmul.mubr.bf16.vlgmr.msra.gmra.mrb[8].mxu0 %v6488_v16  ;;  %3701 = vmatmul.mubr.bf16.vlgmr.msra.gmra.mrb[20].mxu1 %v6488_v16  ;;  %v2432_v55 = vadd.f32 %v6496_v19, %v2300_v47  ;;  %v5186_v19 = vld [vmem:[%s6960_s8 + $0xf4] ss:$28 sps:$4 sm:$0xff]  }
 0x403   : > { %v2434_v21 = vadd.f32 %v2433_v20, %v2304_v15  ;;  %3628 = vmatpush1.bf16.msra.mxu0 %v5110_v12  ;;  %3710 = vmatpush1.bf16.msra.mxu1 %v5113_v13  ;;  %v2435_v14 = vpop.f32.mrb[18].mxu1  ;;  %v5174_v12 = vld [vmem:[%s6960_s8 + $0x80] ss:$28 sps:$4 sm:$0xff]   ;;  %v5187_v20 = vld [vmem:[%s6960_s8 + $0x2b8] ss:$28 sps:$4 sm:$0xff]  }
 0x404   : > { %v2436_v24 = vpop.f32.mrb[19].mxu1  ;;  %3629 = vmatprep.subr.bf16.mxu0 %v5118_v17  ;;  %3711 = vmatprep.subr.bf16.mxu1 %v5121_v18  ;;  %v2440_v60 = vmax.f32 %v2432_v55, 0.0  ;;  %v5181_v13 = vld [vmem:[%s6960_s8 + $0xbc] ss:$28 sps:$4 sm:$0xff]   ;;  %v5222_v47 = vld [vmem:[%s6960_s8 + $0x2b4] ss:$28 sps:$4 sm:$0xff]  }
 0x405   : > { %v2441_v27 = vmax.f32 %v2434_v21, 0.0  ;;  %v5182_v15 = vld [vmem:[%s6960_s8 + $0x280] ss:$28 sps:$4 sm:$0xff]   ;;  %v5179_v17 = vld [vmem:[%s6960_s8 + $0xb8] ss:$28 sps:$4 sm:$0xff]  }
 0x406   : > { %v6610_v0 = vpack.c.bf16 %v2440_v60, %v2440_v60  ;;  %v5183_v18 = vld [vmem:[%s6960_s8 + $0xc0] ss:$28 sps:$4 sm:$0xff]   ;;  %v5184_v21 = vld [vmem:[%s6960_s8 + $0xf0] ss:$28 sps:$4 sm:$0xff]   ;;  %v5188_v14 = vld [vmem:[%s6960_s8 + $0xf8] ss:$28 sps:$4 sm:$0xff]  }
 0x407   : > { %v6514_v28 = vpack.c.bf16 %v2441_v27, %v2441_v27  ;;  %3630 = vmatpush1.bf16.msra.mxu0 %v5116_v22  ;;  %3712 = vmatpush1.bf16.msra.mxu1 %v5119_v23  ;;  %v5191_v22 = vld [vmem:[%s6960_s8 + $0x12c] ss:$28 sps:$4 sm:$0xff]   ;;  %v5232_v60 = vld [vmem:[%s6960_s8 + $0x358] ss:$28 sps:$4 sm:$0xff]  }
 0x408   : > { %3631 = vmatprep.subr.bf16.mxu0 %v5124_v25  ;;  %3713 = vmatprep.subr.bf16.mxu1 %v5127_v26  ;;  %v5192_v23 = vld [vmem:[%s6960_s8 + $0x2f0] ss:$28 sps:$4 sm:$0xff]   ;;  %v5189_v24 = vld [vmem:[%s6960_s8 + $0x128] ss:$28 sps:$4 sm:$0xff]  }
 0x409   : > { %4532 = vmatprep.mubr.msk.bf16.mxu0 %vm1640_vm0, %v6514_v28  ;;  %4533 = vmatprep.mubr.msk.bf16.mxu1 %vm1640_vm0, %v6514_v28  ;;  %v5193_v25 = vld [vmem:[%s6960_s8 + $0x130] ss:$28 sps:$4 sm:$0xff]   ;;  %v5196_v26 = vld [vmem:[%s6960_s8 + $0x164] ss:$28 sps:$4 sm:$0xff]  }
 0x40a   : > { %v5197_v27 = vld [vmem:[%s6960_s8 + $0x328] ss:$28 sps:$4 sm:$0xff]   ;;  %v5227_v55 = vld [vmem:[%s6960_s8 + $0x4b0] ss:$28 sps:$4 sm:$0xff]  }
 0x40b   : > { %3632 = vmatpush1.bf16.msra.mxu0 %v5122_v29  ;;  %3714 = vmatpush1.bf16.msra.mxu1 %v5125_v30  ;;  %v5194_v29 = vld [vmem:[%s6960_s8 + $0x160] ss:$28 sps:$4 sm:$0xff]   ;;  %v5198_v30 = vld [vmem:[%s6960_s8 + $0x168] ss:$28 sps:$4 sm:$0xff]  }
 0x40c   : > { %3633 = vmatprep.subr.bf16.mxu0 %v5130_v31  ;;  %3715 = vmatprep.subr.bf16.mxu1 %v5133_v32  ;;  %v5201_v31 = vld [vmem:[%s6960_s8 + $0x19c] ss:$28 sps:$4 sm:$0xff]  }
 0x40d   : > { %v5202_v32 = vld [vmem:[%s6960_s8 + $0x360] ss:$28 sps:$4 sm:$0xff]  }
 0x40f   : > { %3634 = vmatpush1.bf16.msra.mxu0 %v5128_v33  ;;  %3716 = vmatpush1.bf16.msra.mxu1 %v5131_v34  ;;  %v5199_v33 = vld [vmem:[%s6960_s8 + $0x198] ss:$28 sps:$4 sm:$0xff]   ;;  %v5203_v34 = vld [vmem:[%s6960_s8 + $0x1a0] ss:$28 sps:$4 sm:$0xff]  }
 0x410   : > { %3635 = vmatprep.subr.bf16.mxu0 %v5136_v35  ;;  %3717 = vmatprep.subr.bf16.mxu1 %v5139_v36  ;;  %v5206_v35 = vld [vmem:[%s6960_s8 + $0x1d4] ss:$28 sps:$4 sm:$0xff]  }
 0x411   : > { %v5204_v36 = vld [vmem:[%s6960_s8 + $0x1d0] ss:$28 sps:$4 sm:$0xff]  }
 0x413   : > { %3636 = vmatpush1.bf16.msra.mxu0 %v5134_v37  ;;  %3718 = vmatpush1.bf16.msra.mxu1 %v5137_v38  ;;  %v5207_v37 = vld [vmem:[%s6960_s8 + $0x398] ss:$28 sps:$4 sm:$0xff]   ;;  %v5210_v38 = vld [vmem:[%s6960_s8 + $0x20c] ss:$28 sps:$4 sm:$0xff]  }
 0x414   : > { %3637 = vmatprep.subr.bf16.mxu0 %v5142_v39  ;;  %3719 = vmatprep.subr.bf16.mxu1 %v5145_v40  ;;  %v5208_v39 = vld [vmem:[%s6960_s8 + $0x208] ss:$28 sps:$4 sm:$0xff]   ;;  %v5211_v40 = vld [vmem:[%s6960_s8 + $0x3d0] ss:$28 sps:$4 sm:$0xff]  }
 0x417   : > { %3638 = vmatpush1.bf16.msra.mxu0 %v5140_v41  ;;  %3720 = vmatpush1.bf16.msra.mxu1 %v5143_v42  ;;  %v5214_v41 = vld [vmem:[%s6960_s8 + $0x244] ss:$28 sps:$4 sm:$0xff]  }
 0x418   : > { %3639 = vmatprep.subr.bf16.mxu0 %v5148_v43  ;;  %3721 = vmatprep.subr.bf16.mxu1 %v5151_v44  ;;  %v5212_v42 = vld [vmem:[%s6960_s8 + $0x240] ss:$28 sps:$4 sm:$0xff]   ;;  %v5215_v43 = vld [vmem:[%s6960_s8 + $0x408] ss:$28 sps:$4 sm:$0xff]  }
 0x419   : > { %v5218_v44 = vld [vmem:[%s6960_s8 + $0x27c] ss:$28 sps:$4 sm:$0xff]  }
 0x41b   : > { %3640 = vmatpush1.bf16.msra.mxu0 %v5146_v45  ;;  %3722 = vmatpush1.bf16.msra.mxu1 %v5149_v46  ;;  %v5216_v45 = vld [vmem:[%s6960_s8 + $0x278] ss:$28 sps:$4 sm:$0xff]   ;;  %v5219_v46 = vld [vmem:[%s6960_s8 + $0x440] ss:$28 sps:$4 sm:$0xff]  }
 0x41c   : > { %3641 = vmatprep.subr.bf16.mxu0 %v5154_v48  ;;  %3723 = vmatprep.subr.bf16.mxu1 %v5157_v51  ;;  %v5220_v48 = vld [vmem:[%s6960_s8 + $0x2b0] ss:$28 sps:$4 sm:$0xff]   ;;  %v5223_v51 = vld [vmem:[%s6960_s8 + $0x478] ss:$28 sps:$4 sm:$0xff]  }
 0x41f   : > { %3642 = vmatpush1.bf16.msra.mxu0 %v5152_v53  ;;  %3724 = vmatpush1.bf16.msra.mxu1 %v5155_v54  ;;  %v5226_v53 = vld [vmem:[%s6960_s8 + $0x2ec] ss:$28 sps:$4 sm:$0xff]  }
 0x420   : > { %3643 = vmatprep.subr.bf16.mxu0 %v5160_v56  ;;  %3725 = vmatprep.subr.bf16.mxu1 %v5163_v57  ;;  %v5224_v54 = vld [vmem:[%s6960_s8 + $0x2e8] ss:$28 sps:$4 sm:$0xff]   ;;  %v5228_v57 = vld [vmem:[%s6960_s8 + $0x320] ss:$28 sps:$4 sm:$0xff]  }
 0x421   : > { %v5230_v56 = vld [vmem:[%s6960_s8 + $0x324] ss:$28 sps:$4 sm:$0xff]  }
 0x423   : > { %3644 = vmatpush1.bf16.msra.mxu0 %v5158_v58  ;;  %3726 = vmatpush1.bf16.msra.mxu1 %v5161_v59  ;;  %v5231_v58 = vld [vmem:[%s6960_s8 + $0x4e8] ss:$28 sps:$4 sm:$0xff]   ;;  %v5234_v59 = vld [vmem:[%s6960_s8 + $0x35c] ss:$28 sps:$4 sm:$0xff]  }
 0x424   : > { %3750 = vmatprep.subr.bf16.mxu0 %v5166_v61  ;;  %4563 = vmatprep.subr.bf16.mxu1 %v5167_v62  ;;  %v5235_v61 = vld [vmem:[%s6960_s8 + $0x520] ss:$28 sps:$4 sm:$0xff]   ;;  %v5238_v62 = vld [vmem:[%s6960_s8 + $0x394] ss:$28 sps:$4 sm:$0xff]  }
 0x426   : > { %3660 = vmatmul.mubr.bf16.vlgmr.msra.gmra.mrb[8].mxu0 %v6610_v0  ;;  %3742 = vmatmul.mubr.bf16.vlgmr.msra.gmra.mrb[20].mxu1 %v6610_v0 }
 0x427   : > { %3751 = vmatpush1.bf16.msra.mxu0 %v5164_v63  ;;  %3782 = vmatprep.mubr.bf16.mxu0 %v6478_v11  ;;  %v5236_v63 = vld [vmem:[%s6960_s8 + $0x390] ss:$28 sps:$4 sm:$0xff]  }
 0x428   : > { %4564 = vmatpush3.bf16.msra.mxu1 %v5168_v1  ;;  %3864 = vmatprep.mubr.bf16.mxu1 %v6478_v11  ;;  %v5178_v11 = vld [vmem:[%s6960_s8 + $0x88] ss:$28 sps:$4 sm:$0xff]   ;;  %v5239_v1 = vld [vmem:[%s6960_s8 + $0x558] ss:$28 sps:$4 sm:$0xff]  }
 0x429   : > { %3752 = vmatprep.subr.bf16.mxu0 %v5171_v3  ;;  %4565 = vmatprep.subr.bf16.mxu1 %v5172_v6  ;;  %v5242_v3 = vld [vmem:[%s6960_s8 + $0x3cc] ss:$28 sps:$4 sm:$0xff]  }
 0x42a   : > { %v5240_v6 = vld [vmem:[%s6960_s8 + $0x3c8] ss:$28 sps:$4 sm:$0xff]  }
 0x42b   : > { %3753 = vmatpush1.bf16.msra.mxu0 %v5169_v7  ;;  %v5245_v7 = vld [vmem:[%s6960_s8 + $0x404] ss:$28 sps:$4 sm:$0xff]  }
 0x42c   : > { %4566 = vmatpush3.bf16.msra.mxu1 %v5173_v8  ;;  %3754 = vmatprep.subr.bf16.mxu0 %v5176_v9  ;;  %v5251_v8 = vld [vmem:[%s6960_s8 + $0x474] ss:$28 sps:$4 sm:$0xff]  }
 0x42d   : > { %4567 = vmatprep.subr.bf16.mxu1 %v5177_v10  ;;  %v5249_v9 = vld [vmem:[%s6960_s8 + $0x470] ss:$28 sps:$4 sm:$0xff]  }
 0x42e   : > { %v5254_v10 = vld [vmem:[%s6960_s8 + $0x4ac] ss:$28 sps:$4 sm:$0xff]  }
 0x42f   : > { %3755 = vmatpush1.bf16.msra.mxu0 %v5174_v12  ;;  %v5252_v12 = vld [vmem:[%s6960_s8 + $0x4a8] ss:$28 sps:$4 sm:$0xff]  }
 0x430   : > { %4568 = vmatpush3.bf16.msra.mxu1 %v5178_v11  ;;  %3756 = vmatprep.subr.bf16.mxu0 %v5181_v13  ;;  %v5257_v11 = vld [vmem:[%s6960_s8 + $0x4e4] ss:$28 sps:$4 sm:$0xff]  }
 0x431   : > { %4569 = vmatprep.subr.bf16.mxu1 %v5182_v15  ;;  %v5255_v13 = vld [vmem:[%s6960_s8 + $0x4e0] ss:$28 sps:$4 sm:$0xff]  }
 0x432   : > { %v5260_v15 = vld [vmem:[%s6960_s8 + $0x51c] ss:$28 sps:$4 sm:$0xff]  }
 0x433   : > { %3757 = vmatpush1.bf16.msra.mxu0 %v5179_v17  ;;  %v5258_v17 = vld [vmem:[%s6960_s8 + $0x518] ss:$28 sps:$4 sm:$0xff]  }
 0x434   : > { %4570 = vmatpush3.bf16.msra.mxu1 %v5183_v18  ;;  %3758 = vmatprep.subr.bf16.mxu0 %v5186_v19  ;;  %v5263_v18 = vld [vmem:[%s6960_s8 + $0x554] ss:$28 sps:$4 sm:$0xff]  }
 0x435   : > { %4571 = vmatprep.subr.bf16.mxu1 %v5187_v20  ;;  %v5261_v19 = vld [vmem:[%s6960_s8 + $0x550] ss:$28 sps:$4 sm:$0xff]   ;;  %v6852_v20 = vld [vmem:[%s6961_s9] sm:$0x7f] }
 0x437   : > { %3759 = vmatpush1.bf16.msra.mxu0 %v5184_v21  ;;  %v2651_v21 = vrot.slane %v6852_v20, %v6209_v50 }
 0x438   : > { %4572 = vmatpush3.bf16.msra.mxu1 %v5188_v14  ;;  %3760 = vmatprep.subr.bf16.mxu0 %v5191_v22  ;;  %v2659_v14 = vrot.slane %v6852_v20, %v6220_v4  ;;  %v2655_v22 = vrot.slane %v6852_v20, %v6215_v52 }
 0x439   : > { %4573 = vmatprep.subr.bf16.mxu1 %v5192_v23  ;;  %v2663_v23 = vrot.slane %v6852_v20, %v6223_v5 }
 0x43b   : > { %3761 = vmatpush1.bf16.msra.mxu0 %v5189_v24 }
 0x43c   : > { %4574 = vmatpush3.bf16.msra.mxu1 %v5193_v25  ;;  %3762 = vmatprep.subr.bf16.mxu0 %v5196_v26 }
 0x43d   : > { %4575 = vmatprep.subr.bf16.mxu1 %v5197_v27 }
 0x43f   : > { %3763 = vmatpush1.bf16.msra.mxu0 %v5194_v29 }
 0x440   : > { %4576 = vmatpush3.bf16.msra.mxu1 %v5198_v30  ;;  %3764 = vmatprep.subr.bf16.mxu0 %v5201_v31 }
 0x441   : > { %4577 = vmatprep.subr.bf16.mxu1 %v5202_v32 }
 0x443   : > { %3765 = vmatpush1.bf16.msra.mxu0 %v5199_v33 }
 0x444   : > { %4578 = vmatpush3.bf16.msra.mxu1 %v5203_v34  ;;  %3766 = vmatprep.subr.bf16.mxu0 %v5206_v35 }
 0x445   : > { %3872 = vmatprep.subr.bf16.mxu1 %v5391_v2 }
 0x447   : > { %3865 = vmatmul.mubr.bf16.vlgmr.msra.gmra.mrb[24].mxu1 %v6488_v16  ;;  %3767 = vmatpush1.bf16.msra.mxu0 %v5204_v36 }
 0x448   : > { %3873 = vmatpush1.bf16.msra.mxu1 %v5207_v37  ;;  %4535 = vmatprep.mubr.msk.bf16.mxu1 %vm1640_vm0, %v6514_v28 }
 0x449   : > { %3768 = vmatprep.subr.bf16.mxu0 %v5210_v38  ;;  %3874 = vmatprep.subr.bf16.mxu1 %v5391_v2 }
 0x44b   : > { %3769 = vmatpush1.bf16.msra.mxu0 %v5208_v39 }
 0x44c   : > { %3875 = vmatpush1.bf16.msra.mxu1 %v5211_v40  ;;  %3770 = vmatprep.subr.bf16.mxu0 %v5214_v41 }
 0x44d   : > { %3876 = vmatprep.subr.bf16.mxu1 %v5391_v2 }
 0x44f   : > { %3771 = vmatpush1.bf16.msra.mxu0 %v5212_v42 }
 0x450   : > { %3877 = vmatpush1.bf16.msra.mxu1 %v5215_v43  ;;  %3772 = vmatprep.subr.bf16.mxu0 %v5218_v44 }
 0x451   : > { %3878 = vmatprep.subr.bf16.mxu1 %v5391_v2 }
 0x453   : > { %3773 = vmatpush1.bf16.msra.mxu0 %v5216_v45 }
 0x454   : > { %3879 = vmatpush1.bf16.msra.mxu1 %v5219_v46  ;;  %3774 = vmatprep.subr.bf16.mxu0 %v5222_v47 }
 0x455   : > { %3880 = vmatprep.subr.bf16.mxu1 %v5391_v2 }
 0x457   : > { %3775 = vmatpush1.bf16.msra.mxu0 %v5220_v48 }
 0x458   : > { %3881 = vmatpush1.bf16.msra.mxu1 %v5223_v51  ;;  %3776 = vmatprep.subr.bf16.mxu0 %v5226_v53 }
 0x459   : > { %3882 = vmatprep.subr.bf16.mxu1 %v5391_v2 }
 0x45b   : > { %3777 = vmatpush1.bf16.msra.mxu0 %v5224_v54 }
 0x45c   : > { %3883 = vmatpush1.bf16.msra.mxu1 %v5227_v55  ;;  %3778 = vmatprep.subr.bf16.mxu0 %v5230_v56 }
 0x45d   : > { %3884 = vmatprep.subr.bf16.mxu1 %v5391_v2 }
 0x45f   : > { %3779 = vmatpush1.bf16.msra.mxu0 %v5228_v57 }
 0x460   : > { %3885 = vmatpush1.bf16.msra.mxu1 %v5231_v58  ;;  %3780 = vmatprep.subr.bf16.mxu0 %v5234_v59 }
 0x461   : > { %3886 = vmatprep.subr.bf16.mxu1 %v5391_v2 }
 0x463   : > { %3781 = vmatpush1.bf16.msra.mxu0 %v5232_v60 }
 0x464   : > { %3887 = vmatpush1.bf16.msra.mxu1 %v5235_v61  ;;  %3791 = vmatprep.subr.bf16.mxu0 %v5238_v62 }
 0x465   : > { %3888 = vmatprep.subr.bf16.mxu1 %v5391_v2  ;;  %v5243_v2 = vld [vmem:[%s6960_s8 + $0x400] ss:$28 sps:$4 sm:$0xff]  }
 0x466   : > { %3783 = vmatmul.mubr.bf16.vlgmr.msra.gmra.mrb[12].mxu0 %v6488_v16  ;;  %v5248_v16 = vld [vmem:[%s6960_s8 + $0x43c] ss:$28 sps:$4 sm:$0xff]  }
 0x467   : > { %3792 = vmatpush1.bf16.msra.mxu0 %v5236_v63  ;;  %4534 = vmatprep.mubr.msk.bf16.mxu0 %vm1640_vm0, %v6514_v28  ;;  %v5246_v28 = vld [vmem:[%s6960_s8 + $0x438] ss:$28 sps:$4 sm:$0xff]  }
 0x468   : > { %3889 = vmatpush1.bf16.msra.mxu1 %v5239_v1  ;;  %3793 = vmatprep.subr.bf16.mxu0 %v5242_v3 }
 0x46b   : > { %3905 = vmatmul.mubr.bf16.vlgmr.msra.gmra.mrb[28].mxu1 %v6610_v0  ;;  %3794 = vmatpush1.bf16.msra.mxu0 %v5240_v6 }
 0x46c   : > { %3795 = vmatprep.subr.bf16.mxu0 %v5245_v7 }
 0x46f   : > { %3796 = vmatpush1.bf16.msra.mxu0 %v5243_v2 }
 0x470   : > { %3797 = vmatprep.subr.bf16.mxu0 %v5248_v16 }
 0x473   : > { %3798 = vmatpush1.bf16.msra.mxu0 %v5246_v28 }
 0x474   : > { %3799 = vmatprep.subr.bf16.mxu0 %v5251_v8 }
 0x477   : > { %3800 = vmatpush1.bf16.msra.mxu0 %v5249_v9 }
 0x478   : > { %3801 = vmatprep.subr.bf16.mxu0 %v5254_v10 }
 0x47b   : > { %3802 = vmatpush1.bf16.msra.mxu0 %v5252_v12 }
 0x47c   : > { %3803 = vmatprep.subr.bf16.mxu0 %v5257_v11 }
 0x47f   : > { %3804 = vmatpush1.bf16.msra.mxu0 %v5255_v13 }
 0x480   : > { %3805 = vmatprep.subr.bf16.mxu0 %v5260_v15 }
 0x483   : > { %3806 = vmatpush1.bf16.msra.mxu0 %v5258_v17 }
 0x484   : > { %3807 = vmatprep.subr.bf16.mxu0 %v5263_v18 }
 0x487   : > { %3808 = vmatpush1.bf16.msra.mxu0 %v5261_v19 }
 0x48a   : > { %3824 = vmatmul.mubr.bf16.vlgmr.msra.gmra.mrb[12].mxu0 %v6610_v0 }
 0x4f9   : > { %v3661_v24 = vpop.f32.mrb[8].mxu0  ;;  %v3743_v25 = vpop.f32.mrb[20].mxu1 }
 0x4fa   : > { %v4591_v0 = vadd.f32 %v3661_v24, %v2651_v21  ;;  %v4593_v26 = vadd.f32 %v3743_v25, %v2659_v14  ;;  %v3663_v27 = vpop.f32.mrb[9].mxu0  ;;  %v3745_v29 = vpop.f32.mrb[21].mxu1 }
 0x4fb   : > { %v4592_v30 = vadd.f32 %v3663_v27, %v2655_v22  ;;  %v4594_v31 = vadd.f32 %v3745_v29, %v2663_v23  ;;  %v3665_v32 = vpop.f32.mrb[10].mxu0  ;;  %v3747_v50 = vpop.f32.mrb[22].mxu1 }
 0x4fc   : > { %v3912_v33 = vsub.f32 0.0, %v4591_v0  ;;  %v3914_v4 = vsub.f32 0.0, %v4593_v26  ;;  %v3666_v34 = vpop.f32.mrb[11].mxu0  ;;  %v3748_v52 = vpop.f32.mrb[23].mxu1 }
 0x4fd   : > { %v3913_v35 = vsub.f32 0.0, %v4592_v30  ;;  %v3915_v36 = vsub.f32 0.0, %v4594_v31 }
 0x4fe   : > { %v3919_v5 = vmul.f32 1.442695, %v3912_v33  ;;  %v3923_v37 = vmul.f32 1.442695, %v3914_v4 }
 0x4ff   : > { %v3921_v38 = vmul.f32 1.442695, %v3913_v35  ;;  %v3925_v39 = vmul.f32 1.442695, %v3915_v36 }
 0x500   : > { %5266 = vpow2.f32 %v3919_v5 }
 0x501   : > { %5268 = vpow2.f32 %v3923_v37 }
 0x502   : > { %5270 = vpow2.f32 %v3921_v38 }
 0x503   : > { %5272 = vpow2.f32 %v3925_v39 }
 0x504   : > { %5308 = shalt.err (!%p5305_p3)
}
 0x505   : > { %s5309_s13 = scalar_lea.hbm %s6867_s0, 128  ;;  %s5313_s25 = scalar_lea.hbm %s6963_s11, 256 }
 0x506   : > { %p5310_p4 = scmp.ne.s32.totalorder %s6867_s0, %s5309_s13  ;;  %p5314_p9 = scmp.lt.u32.totalorder %s6867_s0, %s6963_s11 }
 0x507   : > { %p5315_p10 = scmp.lt.u32.totalorder %s5313_s25, %s5309_s13  ;;  %p5317_p12 = scmp.lt.u32.totalorder %s5309_s13, %s6867_s0 }
 0x508   : > { %p5311_p7 = pnand %p5310_p4, %p5493_p5 }
 0x509   : > { %p5316_p11 = por %p5315_p10, %p5314_p9 }
 0x50a   : > { %p5312_p8 = pneg %p5311_p7 }
 0x50b   : > { %p5318_p13 = por %p5317_p12, %p5316_p11 }
 0x50d   : > { %p5319_p0 = pnand %p5318_p13, %p5312_p8 }
 0x50f   : > { %5322 = shalt.err (!%p5319_p0)
}
 0x510   : > { %4633 = dma.vmem_to_hbm [thread:$0]  (%p5493_p5), %s4004_s16, 128, %s6867_s0, %s3976_s26   ;;  %v5267_v40 = vpop.eup %5266  ;;  %v2674_v2 = vsub.s32 6, %v6206_v49  ;;  %v2666_v19 = vsub.s32 4, %v6206_v49  ;;  %v2670_v21 = vsub.s32 5, %v6206_v49 }
 0x511   : > { %v5269_v41 = vpop.eup %5268  ;;  %v3933_v42 = vadd.f32 1.0, %v5267_v40  ;;  %s4629_s15 = smul.u32 56, %s6236_s22  ;;  %s3971_s24 = scalar_lea.sflag [#allocation3], %s6236_s22 }
 0x512   : > { %v5271_v43 = vpop.eup %5270  ;;  %v3935_v44 = vadd.f32 1.0, %v5269_v41  ;;  %v2675_v16 = vrot.slane %v6852_v20, %v2674_v2  ;;  %v2667_v14 = vrot.slane %v6852_v20, %v2666_v19  ;;  %v2671_v22 = vrot.slane %v6852_v20, %v2670_v21  ;;  %s4631_s0 = smul.u32 896, %s5476_s21  ;;  %s5394_s14 = smov [#allocation2]  }
 0x513   : > { %v5273_v45 = vpop.eup %5272  ;;  %5274 = vrcp.f32 %v3933_v42  ;;  %v3934_v46 = vadd.f32 1.0, %v5271_v43  ;;  %s6888_s16 = scalar_lea.vmem [#allocation2], %s4629_s15  ;;  %s5327_s25 = sshll.u32 %s5394_s14, 4  ;;  %s5328_s25 = int_to_ptr.vmem [resolvable:$false] %s5327_s25 }
 0x514   : > { %5276 = vrcp.f32 %v3935_v44  ;;  %v3936_v47 = vadd.f32 1.0, %v5273_v45  ;;  %s3990_s26 = sshll.u32 %s6888_s16, 4  ;;  %s6907_s13 = scalar_lea.hbm %s6962_s10, %s4631_s0  ;;  %s6909_s26 = int_to_ptr.vmem [resolvable:$true] %s3990_s26 }
 0x515   : > { %5278 = vrcp.f32 %v3934_v46  ;;  %s5323_s21 = scalar_lea.vmem %s6909_s26, 896  ;;  %s5329_s19 = scalar_lea.vmem %s5328_s25, 1792 }
 0x516   : > { %5280 = vrcp.f32 %v3936_v47  ;;  %p5324_p1 = scmp.ne.s32.totalorder %s6909_s26, %s5323_s21  ;;  %p5330_p4 = scmp.lt.s32.totalorder %s6909_s26, %s5328_s25 }
 0x517   : > { %p5331_p7 = scmp.lt.s32.totalorder %s5329_s19, %s5323_s21 }
 0x518   : > { %p5325_p2 = pnand %p5324_p1, %p5493_p5 }
 0x519   : > { %p5332_p8 = por %p5331_p7, %p5330_p4 }
 0x51a   : > { %v4579_v59 = vpop.f32.mrb[24].mxu1  ;;  %p5326_p3 = pneg %p5325_p2 }
 0x51b   : > { %v4580_v62 = vpop.f32.mrb[25].mxu1 }
 0x51c   : > { %v4581_v1 = vadd.f32 %v4580_v62, %v4579_v59  ;;  %v4582_v3 = vpop.f32.mrb[26].mxu1  ;;  %p5333_p9 = pnand %p5332_p8, %p5326_p3 }
 0x51d   : > { %v5275_v48 = vpop.eup %5274  ;;  %v4583_v7 = vpop.f32.mrb[27].mxu1 }
 0x51e   : > { %v5277_v51 = vpop.eup %5276  ;;  %v3947_v53 = vmax.f32 %v5275_v48, 0.0  ;;  %v3867_v28 = vadd.f32 %v4581_v1, %v2675_v16 }
 0x51f   : > { %v5279_v54 = vpop.eup %5278  ;;  %v3949_v55 = vmax.f32 %v5277_v51, 0.0 }
 0x520   : > { %v5281_v56 = vpop.eup %5280  ;;  %v3954_v57 = vmin.f32 %v3947_v53, 1.0  ;;  %v3948_v58 = vmax.f32 %v5279_v54, 0.0 }
 0x521   : > { %v3956_v60 = vmin.f32 %v3949_v55, 1.0  ;;  %v3950_v61 = vmax.f32 %v5281_v56, 0.0 }
 0x522   : > { %3961 = vst [vmem:[%s6888_s16] sm:$0xff] %v3954_v57  ;;  %v3955_v63 = vmin.f32 %v3948_v58, 1.0 }
 0x523   : > { %3963 = vst [vmem:[%s6888_s16 + $0x10] sm:$0xff] %v3956_v60  ;;  %v3957_v6 = vmin.f32 %v3950_v61, 1.0 }
 0x524   : > { %3962 = vst [vmem:[%s6888_s16 + $0x8] sm:$0xff] %v3955_v63 }
 0x525   : > { %3964 = vst [vmem:[%s6888_s16 + $0x18] sm:$0xff] %v3957_v6 }
 0x53e   : > { %v3906_v8 = vpop.f32.mrb[28].mxu1 }
 0x53f   : > { %v3907_v9 = vadd.f32 %v3906_v8, %v3867_v28  ;;  %v3908_v10 = vpop.f32.mrb[29].mxu1 }
 0x540   : > { %v3909_v12 = vpop.f32.mrb[30].mxu1 }
 0x541   : > { %v3918_v11 = vsub.f32 0.0, %v3907_v9  ;;  %v3910_v13 = vpop.f32.mrb[31].mxu1 }
 0x543   : > { %v3931_v15 = vmul.f32 1.442695, %v3918_v11 }
 0x545   : > { %5282 = vpow2.f32 %v3931_v15 }
 0x54f   : > { %v5283_v17 = vpop.eup %5282 }
 0x550   : > { %v3939_v18 = vadd.f32 1.0, %v5283_v17 }
 0x552   : > { %5284 = vrcp.f32 %v3939_v18 }
 0x55c   : > { %v5285_v23 = vpop.eup %5284 }
 0x55d   : > { %v3953_v24 = vmax.f32 %v5285_v23, 0.0  ;;  %v3825_v25 = vpop.f32.mrb[12].mxu0 }
 0x55e   : > { %v4595_v0 = vadd.f32 %v3825_v25, %v2667_v14  ;;  %v3827_v26 = vpop.f32.mrb[13].mxu0 }
 0x55f   : > { %v3960_v27 = vmin.f32 %v3953_v24, 1.0  ;;  %v4596_v29 = vadd.f32 %v3827_v26, %v2671_v22  ;;  %v3829_v30 = vpop.f32.mrb[14].mxu0 }
 0x560   : > { %v3916_v31 = vsub.f32 0.0, %v4595_v0  ;;  %v3830_v32 = vpop.f32.mrb[15].mxu0 }
 0x561   : > { %3967 = vst.msk [vmem:[%s6888_s16 + $0x30] sm:$0xff] %vm1640_vm0, %v3960_v27  ;;  %v3917_v50 = vsub.f32 0.0, %v4596_v29 }
 0x562   : > { %v3927_v49 = vmul.f32 1.442695, %v3916_v31 }
 0x563   : > { %v3929_v33 = vmul.f32 1.442695, %v3917_v50 }
 0x564   : > { %5286 = vpow2.f32 %v3927_v49 }
 0x565   : > { %5288 = vpow2.f32 %v3929_v33 }
 0x56e   : > { %v5287_v20 = vpop.eup %5286 }
 0x56f   : > { %v5289_v4 = vpop.eup %5288  ;;  %v3937_v34 = vadd.f32 1.0, %v5287_v20 }
 0x570   : > { %v3938_v52 = vadd.f32 1.0, %v5289_v4 }
 0x571   : > { %5290 = vrcp.f32 %v3937_v34 }
 0x572   : > { %5292 = vrcp.f32 %v3938_v52 }
 0x57b   : > { %v5291_v35 = vpop.eup %5290 }
 0x57c   : > { %v5293_v36 = vpop.eup %5292  ;;  %v3951_v5 = vmax.f32 %v5291_v35, 0.0 }
 0x57d   : > { %v3952_v37 = vmax.f32 %v5293_v36, 0.0 }
 0x57e   : > { %v3958_v38 = vmin.f32 %v3951_v5, 1.0 }
 0x57f   : > { %v3959_v39 = vmin.f32 %v3952_v37, 1.0 }
 0x580   : > { %3965 = vst [vmem:[%s6888_s16 + $0x20] sm:$0xff] %v3958_v38 }
 0x581   : > { %3966 = vst [vmem:[%s6888_s16 + $0x28] sm:$0xff] %v3959_v39 }
 0x582   : > { %5336 = shalt.err (!%p5333_p9)
}
 0x583   : > { %s5337_s22 = scalar_lea.hbm %s6907_s13, 896  ;;  %s5341_s16 = scalar_lea.hbm %s6962_s10, 1792 }
 0x584   : > { %p5338_p10 = scmp.ne.s32.totalorder %s6907_s13, %s5337_s22  ;;  %p5342_p13 = scmp.lt.u32.totalorder %s6907_s13, %s6962_s10 }
 0x585   : > { %p5343_p0 = scmp.lt.u32.totalorder %s5341_s16, %s5337_s22  ;;  %p5345_p2 = scmp.lt.u32.totalorder %s5337_s22, %s6907_s13 }
 0x586   : > { %p5339_p11 = pnand %p5338_p10, %p5493_p5 }
 0x587   : > { %p5344_p1 = por %p5343_p0, %p5342_p13 }
 0x588   : > { %p5340_p12 = pneg %p5339_p11 }
 0x589   : > { %p5346_p3 = por %p5345_p2, %p5344_p1 }
 0x58b   : > { %p5347_p4 = pnand %p5346_p3, %p5340_p12 }
 0x58d   : > { %5350 = shalt.err (!%p5347_p4)
}
 0x58e   : > { %4632 = dma.vmem_to_hbm [thread:$0]  (%p5493_p5), %s6909_s26, 896, %s6907_s13, %s3971_s24  }
 0x58f PF: > { %p4643_p7 = scmp.ge.s32.totalorder %s5389_s20, 2  ;;  %s4015_s12 = sand.u32 1, %s5377_s17  }
 0x590   : > { %s4016_s21 = scalar_lea.sflag [#allocation3], %s4015_s12 }
 0x591   : > { %p4637_p8 = pnand %p4643_p7, %p5497_p6 }
 0x593   : > { %5368 = dma.done.wait (!%p4637_p8), %s4016_s21, 896  }
 0x594   : > { %5370 = vsyncadd (!%p4637_p8), %s4016_s21, 4294966400  ;;  %s4025_s14 = scalar_lea.sflag [#allocation5], %s4015_s12 }
 0x595   : > { %5372 = dma.done.wait (!%p4637_p8), %s4025_s14, 128  }
 0x596   : > { %5374 = vsyncadd (!%p4637_p8), %s4025_s14, 4294967168  ;;  %s6971_s27 = sld [smem:[#allocation8_spill]]  ;;  %s6972_s19 = sld [smem:[#allocation9_spill]] }
 0x597   : > { %p25_p5 = scmp.ge.s32.totalorder %s5480_s23, 4   ;;  %s6973_s17 = smov %s5381_s18 }
 0x598   : > { %s6975_s20 = smov %s5480_s23 }
 0x599   :  { %27 = sbr.rel (!%p25_p5) target bundleno = 7 (0x7), region = 115 }
 0x59c   : > { %s6974_s18 = smov %s6971_s27 }
 0x5a0   :  { %4030 = vsyncpa [#allocation3], 1 }
 0x5a1   :  { %4032 = vsyncpa [#allocation3 + $0x1], 1 }
 0x5a2   :  { %4033 = vsyncpa [#allocation5], 1 }
 0x5a3   :  { %4035 = vsyncpa [#allocation5 + $0x1], 1 }

</bundles_post_ra>
